<compile_context>
chip_gen: v7x
topology: tpu7x:2x2x1
jax: 0.10.0
libtpu: 0.0.40
codegen_flags: <defaults>
</compile_context>

<pallas_src>
import functools

import jax
import jax.numpy as jnp
from jax import lax
from jax.experimental import pallas as pl
from jax.experimental.pallas import tpu as pltpu


# ----------------------------- Pallas kernel ------------------------------

def _osr_attn_kernel(x_ref, kv_ref, qw_ref, qb_ref, kvw_ref, kvb_ref,
                     o_ref, acc_ref, *, num_heads):
    """Fused q / kv 1x1-conv projections + multi-head softmax attention.

    Per grid step (one batch element, one N-tile):
      x_ref  : (C, TN)   channel-major tokens for q (bf16)
      kv_ref : (C, Nk)   channel-major tokens for k/v (bf16)
      qw_ref : (C, C)    q weight, qk-scale pre-folded (bf16)
      qb_ref : (C, 1)    q bias, qk-scale pre-folded (f32)
      kvw_ref: (2C, C)   stacked k/v weight (bf16)
      kvb_ref: (2C, 1)   stacked k/v bias (f32)
      o_ref  : (C, TN)   attention output (single lane-dense store)
      acc_ref: (C, TN)   f32 VMEM scratch accumulator
    """
    C, TN = x_ref.shape
    Nk = kv_ref.shape[-1]
    hd = C // num_heads
    cdt = x_ref.dtype                                   # compute (MXU) dtype

    x = x_ref[...]
    kv = kv_ref[...]

    # q = (scale * Wq) @ x + scale * bq   -> (C, TN)
    q = jnp.dot(qw_ref[...], x, preferred_element_type=jnp.float32)
    q = (q + qb_ref[...]).astype(cdt)

    # One stacked projection for k and v: (2C, C) @ (C, Nk) -> (2C, Nk).
    kvp = jnp.dot(kvw_ref[...], kv, preferred_element_type=jnp.float32)
    kvp = kvp + kvb_ref[...]
    k = kvp[:C, :].astype(cdt)                           # (C, Nk)
    v = kvp[C:, :].astype(cdt)                           # (C, Nk)

    # Per-head attention, statically unrolled (num_heads is small).  All
    # per-head slices are sublane slices with the full 128-lane width; the
    # scores are built transposed, (Nk, TN), so the softmax reduces over
    # sublanes and every store is lane-dense.
    for h in range(num_heads):
        lo = h * hd
        hi = lo + hd
        q_h = q[lo:hi, :]                                # (hd, TN)
        k_h = k[lo:hi, :]                                # (hd, Nk)
        v_h = v[lo:hi, :]                                # (hd, Nk)

        # s[nk, n] = sum_d k[d, nk] * q[d, n]  (MXU takes transposed LHS).
        s = lax.dot_general(k_h, q_h, (((0,), (0,)), ((), ())),
                            preferred_element_type=jnp.float32)   # (Nk, TN)
        s_max = jnp.max(s, axis=0, keepdims=True)                 # (1, TN)
        p = jnp.exp(s - s_max)                                    # (Nk, TN) f32
        denom = jnp.sum(p, axis=0, keepdims=True)                 # (1, TN)

        o_h = jnp.dot(v_h, p.astype(cdt),
                      preferred_element_type=jnp.float32)         # (hd, TN)
        # Deferred softmax normalization on the small (hd, TN) output.
        acc_ref[lo:hi, :] = o_h * pl.reciprocal(denom, approx=True)

    # Single full-tile, lane-dense output store.
    o_ref[...] = acc_ref[...].astype(o_ref.dtype)


def fused_osr_attention(x_cn, kv_cn, q_w, q_b, kv_w, kv_b, *, num_heads,
                        scale, tile_n=None, compute_dtype=jnp.bfloat16):
    """Single fused pallas_call over (batch, N-tile), channel-major layout."""
    B, C, N = x_cn.shape
    Nk = kv_cn.shape[-1]
    out_dtype = x_cn.dtype

    tn = tile_n or min(N, 512)
    if N % tn != 0:               # keep blocks exact; fall back to one tile
        tn = N
    n_tiles = N // tn

    # Trace-time weight prep (tiny tensors): fold qk scale into q projection,
    # keep the stacked kv weight as-is; biases stay f32 (added post-matmul).
    qw = (q_w * scale).astype(compute_dtype)                   # (C, C)
    qb = (q_b * scale).reshape(C, 1).astype(jnp.float32)       # (C, 1)
    kvw = kv_w.astype(compute_dtype)                           # (2C, C)
    kvb = kv_b.reshape(2 * C, 1).astype(jnp.float32)           # (2C, 1)
    x_in = x_cn.astype(compute_dtype)
    kv_in = kv_cn.astype(compute_dtype)

    kernel = functools.partial(_osr_attn_kernel, num_heads=num_heads)

    in_sz = jnp.dtype(compute_dtype).itemsize
    flops = B * (2 * C * C * N + n_tiles * 4 * C * C * Nk + 4 * C * Nk * N)
    cost = pl.CostEstimate(
        flops=int(flops),
        transcendentals=int(B * num_heads * Nk * N),
        bytes_accessed=int(
            in_sz * (B * C * N + B * n_tiles * C * Nk + 3 * C * C)
            + 4 * (3 * C) + 4 * B * C * N))

    # Per-step VMEM working set (double-buffered blocks + intermediates).
    step_bytes = (
        2 * (C * tn + C * Nk) * in_sz          # double-buffered input blocks
        + 2 * C * tn * jnp.dtype(out_dtype).itemsize   # output block
        + 2 * (3 * C * C) * in_sz              # weights
        + C * tn * (4 + in_sz)                 # q (f32 + bf16)
        + 2 * C * Nk * (4 + in_sz)             # kv projection (f32 + bf16)
        + Nk * tn * (4 + 4 + in_sz)            # scores / probs / bf16 probs
        + C * tn * 4)                          # f32 scratch accumulator
    vmem_limit = int(min(96 * 2**20, max(32 * 2**20, 2 * step_bytes)))

    return pl.pallas_call(
        kernel,
        out_shape=jax.ShapeDtypeStruct((B, C, N), out_dtype),
        grid=(B, n_tiles),
        in_specs=[
            pl.BlockSpec((None, C, tn), lambda b, j: (b, 0, j)),
            pl.BlockSpec((None, C, Nk), lambda b, j: (b, 0, 0)),
            pl.BlockSpec((C, C), lambda b, j: (0, 0)),
            pl.BlockSpec((C, 1), lambda b, j: (0, 0)),
            pl.BlockSpec((2 * C, C), lambda b, j: (0, 0)),
            pl.BlockSpec((2 * C, 1), lambda b, j: (0, 0)),
        ],
        out_specs=pl.BlockSpec((None, C, tn), lambda b, j: (b, 0, j)),
        scratch_shapes=[pltpu.VMEM((C, tn), jnp.float32)],
        compiler_params=pltpu.CompilerParams(
            dimension_semantics=("parallel", "parallel"),
            vmem_limit_bytes=vmem_limit),
        cost_estimate=cost,
    )(x_in, kv_in, qw, qb, kvw, kvb)


# ------------------------------- JAX glue ---------------------------------

def depthwise_conv(x, w, b=None, stride=1, padding=0):
    # x: (B,C,H,W); w: (C,1,kh,kw) (PyTorch OIHW with groups=C)
    C = x.shape[1]
    out = lax.conv_general_dilated(
        x, w, window_strides=(stride, stride),
        padding=((padding, padding), (padding, padding)),
        feature_group_count=C,
        dimension_numbers=("NCHW", "OIHW", "NCHW"))
    if b is not None:
        out = out + b.reshape(1, C, 1, 1)
    return out


def batchnorm_eval(x, gamma, beta, mean, var, eps=1e-5):
    inv = gamma / jnp.sqrt(var + eps)
    return x * inv.reshape(1, -1, 1, 1) + (beta - mean * inv).reshape(1, -1, 1, 1)


def _reference_proj_attention(params, x_cn, kv_cn, num_heads, scale):
    """Pure-jnp f32 reference of the projections + attention (PyTorch order)."""
    B, C, N = x_cn.shape
    Nk = kv_cn.shape[-1]
    hd = C // num_heads
    q = jnp.einsum("oc,bcn->bon", params["q_w"], x_cn) + params["q_b"][None, :, None]
    kvp = jnp.einsum("oc,bcn->bon", params["kv_w"], kv_cn) + params["kv_b"][None, :, None]
    k, v = kvp[:, :C], kvp[:, C:]
    q = q.reshape(B, num_heads, hd, N).transpose(0, 1, 3, 2)     # (B,nh,N,hd)
    k = k.reshape(B, num_heads, hd, Nk)                          # (B,nh,hd,Nk)
    v = v.reshape(B, num_heads, hd, Nk).transpose(0, 1, 3, 2)    # (B,nh,Nk,hd)
    attn = jnp.einsum("bhnd,bhdm->bhnm", q, k) * scale
    attn = jax.nn.softmax(attn, axis=-1)
    out = jnp.einsum("bhnm,bhmd->bhnd", attn, v)                 # (B,nh,N,hd)
    return out.transpose(0, 1, 3, 2).reshape(B, C, N)


# ------------------------------ parameters --------------------------------

def init_params(key, dim, sr_ratio):
    ks = jax.random.split(key, 8)
    p = {}
    p["q_w"] = jax.random.normal(ks[0], (dim, dim), jnp.float32) * 0.05
    p["q_b"] = jax.random.normal(ks[1], (dim,), jnp.float32) * 0.05
    p["kv_w"] = jax.random.normal(ks[2], (2 * dim, dim), jnp.float32) * 0.05
    p["kv_b"] = jax.random.normal(ks[3], (2 * dim,), jnp.float32) * 0.05
    if sr_ratio > 1:
        k_sr = sr_ratio + 3
        p["sr_dw_w"] = jax.random.normal(ks[4], (dim, 1, k_sr, k_sr), jnp.float32) * 0.05
        p["sr_pw_w"] = jax.random.normal(ks[5], (dim, 1, 1, 1), jnp.float32) * 0.2 + 1.0
        # BatchNorm2d (eval): weight=1, bias=0, running_mean=0, running_var=1
        p["bn1"] = (jnp.ones(dim), jnp.zeros(dim), jnp.zeros(dim), jnp.ones(dim))
        p["bn2"] = (jnp.ones(dim), jnp.zeros(dim), jnp.zeros(dim), jnp.ones(dim))
    p["local_w"] = jax.random.normal(ks[6], (dim, 1, 3, 3), jnp.float32) * 0.05
    p["local_b"] = jax.random.normal(ks[7], (dim,), jnp.float32) * 0.05
    return p


# ------------------------------- forward ----------------------------------

def osr_attention_forward(params, x, *, num_heads=8, sr_ratio=2, qk_scale=None,
                          use_pallas=True, tile_n=None):
    B, C, H, W = x.shape
    scale = qk_scale if qk_scale is not None else (C // num_heads) ** (-0.5)
    N = H * W

    # kv = self.sr(x); kv = local_conv(kv) + kv  (plain-JAX depthwise glue)
    if sr_ratio > 1:
        kv = depthwise_conv(x, params["sr_dw_w"], None,
                            stride=sr_ratio, padding=(sr_ratio + 3) // 2)
        kv = batchnorm_eval(kv, *params["bn1"])
        kv = jax.nn.relu(kv)
        kv = depthwise_conv(kv, params["sr_pw_w"], None, stride=1, padding=0)
        kv = batchnorm_eval(kv, *params["bn2"])
    else:
        kv = x
    kv = depthwise_conv(kv, params["local_w"], params["local_b"],
                        stride=1, padding=1) + kv
    Hk, Wk = kv.shape[2], kv.shape[3]

    x_cn = x.reshape(B, C, N)            # free reshape (NCHW flatten)
    kv_cn = kv.reshape(B, C, Hk * Wk)

    if use_pallas:
        out_cn = fused_osr_attention(x_cn, kv_cn, params["q_w"], params["q_b"],
                                     params["kv_w"], params["kv_b"],
                                     num_heads=num_heads, scale=scale,
                                     tile_n=tile_n)
    else:
        out_cn = _reference_proj_attention(params, x_cn, kv_cn, num_heads, scale)
    return out_cn.reshape(B, C, H, W)


# --------------------------------- main ------------------------------------

if __name__ == "__main__":
    B, dim, H, W = 2, 32, 16, 16
    num_heads, sr_ratio = 8, 2

    key = jax.random.PRNGKey(0)
    kx, kp = jax.random.split(key)
    x = jax.random.normal(kx, (B, dim, H, W), jnp.float32)
    params = init_params(kp, dim, sr_ratio)

    out = osr_attention_forward(params, x, num_heads=num_heads,
                                sr_ratio=sr_ratio, use_pallas=True, tile_n=128)
    out = jax.block_until_ready(out)

    ref = osr_attention_forward(params, x, num_heads=num_heads,
                                sr_ratio=sr_ratio, use_pallas=False)
    ref = jax.block_until_ready(ref)

    assert out.shape == (B, dim, H, W), out.shape
    # bf16 MXU operands + approx reciprocal -> loosen from the f32 1e-4 check.
    assert jnp.allclose(out, ref, rtol=2e-2, atol=2e-3), \
        float(jnp.max(jnp.abs(out - ref)))

    print("KERNEL_OK")
</pallas_src>

<mosaic_0001>
module attributes {stable_mosaic.version = 11 : i64} {
  func.func @_osr_attn_kernel(%arg0: i32, %arg1: i32, %arg2: memref<1x32x128xbf16, #tpu.memory_space<vmem>>, %arg3: memref<1x32x64xbf16, #tpu.memory_space<vmem>>, %arg4: memref<32x32xbf16, #tpu.memory_space<vmem>>, %arg5: memref<32x1xf32, #tpu.memory_space<vmem>>, %arg6: memref<64x32xbf16, #tpu.memory_space<vmem>>, %arg7: memref<64x1xf32, #tpu.memory_space<vmem>>, %arg8: memref<1x32x128xf32, #tpu.memory_space<vmem>>, %arg9: memref<32x128xf32, #tpu.memory_space<vmem>>) attributes {dimension_semantics = [#tpu.dimension_semantics<parallel>, #tpu.dimension_semantics<parallel>], iteration_bounds = array<i64: 2, 2>, scalar_prefetch = 0 : i64, scratch_operands = 1 : i64, tpu.core_type = #tpu.core_type<tc>, window_params = [{transform_indices = @transform_0, window_bounds = array<i64: 1, 32, 128>}, {transform_indices = @transform_1, window_bounds = array<i64: 1, 32, 64>}, {pipeline_mode = #tpu.pipeline_mode<synchronous>, transform_indices = @transform_2, window_bounds = array<i64: 32, 32>}, {pipeline_mode = #tpu.pipeline_mode<synchronous>, transform_indices = @transform_3, window_bounds = array<i64: 32, 1>}, {pipeline_mode = #tpu.pipeline_mode<synchronous>, transform_indices = @transform_4, window_bounds = array<i64: 64, 32>}, {pipeline_mode = #tpu.pipeline_mode<synchronous>, transform_indices = @transform_5, window_bounds = array<i64: 64, 1>}, {transform_indices = @transform_6, window_bounds = array<i64: 1, 32, 128>}]} {
    %c0 = arith.constant 0 : index
    %c0_0 = arith.constant 0 : index
    %c0_1 = arith.constant 0 : index
    %0 = vector.load %arg2[%c0, %c0_0, %c0_1] : memref<1x32x128xbf16, #tpu.memory_space<vmem>>, vector<1x32x128xbf16>
    %1 = vector.shape_cast %0 : vector<1x32x128xbf16> to vector<32x128xbf16>
    %c0_2 = arith.constant 0 : index
    %c0_3 = arith.constant 0 : index
    %c0_4 = arith.constant 0 : index
    %2 = vector.load %arg3[%c0_2, %c0_3, %c0_4] : memref<1x32x64xbf16, #tpu.memory_space<vmem>>, vector<1x32x64xbf16>
    %3 = vector.shape_cast %2 : vector<1x32x64xbf16> to vector<32x64xbf16>
    %c0_5 = arith.constant 0 : index
    %c0_6 = arith.constant 0 : index
    %4 = vector.load %arg4[%c0_5, %c0_6] : memref<32x32xbf16, #tpu.memory_space<vmem>>, vector<32x32xbf16>
    %cst = arith.constant dense<0.000000e+00> : vector<32x128xf32>
    %5 = tpu.matmul %4, %1, %cst {dimension_numbers = #tpu.dot_dimension_numbers<[1], [0], [0], [1], [0, 0, 1, 1], [], []>} : vector<32x32xbf16>, vector<32x128xbf16>, vector<32x128xf32> -> vector<32x128xf32>
    %c0_7 = arith.constant 0 : index
    %c0_8 = arith.constant 0 : index
    %6 = vector.load %arg5[%c0_7, %c0_8] : memref<32x1xf32, #tpu.memory_space<vmem>>, vector<32x1xf32>
    %7 = vector.broadcast %6 : vector<32x1xf32> to vector<32x128xf32>
    %8 = arith.addf %5, %7 : vector<32x128xf32>
    %9 = arith.truncf %8 : vector<32x128xf32> to vector<32x128xbf16>
    %c0_9 = arith.constant 0 : index
    %c0_10 = arith.constant 0 : index
    %10 = vector.load %arg6[%c0_9, %c0_10] : memref<64x32xbf16, #tpu.memory_space<vmem>>, vector<64x32xbf16>
    %cst_11 = arith.constant dense<0.000000e+00> : vector<64x64xf32>
    %11 = tpu.matmul %10, %3, %cst_11 {dimension_numbers = #tpu.dot_dimension_numbers<[1], [0], [0], [1], [0, 0, 1, 1], [], []>} : vector<64x32xbf16>, vector<32x64xbf16>, vector<64x64xf32> -> vector<64x64xf32>
    %c0_12 = arith.constant 0 : index
    %c0_13 = arith.constant 0 : index
    %12 = vector.load %arg7[%c0_12, %c0_13] : memref<64x1xf32, #tpu.memory_space<vmem>>, vector<64x1xf32>
    %13 = vector.broadcast %12 : vector<64x1xf32> to vector<64x64xf32>
    %14 = arith.addf %11, %13 : vector<64x64xf32>
    %15 = vector.extract_strided_slice %14 {offsets = [0, 0], sizes = [32, 64], strides = [1, 1]} : vector<64x64xf32> to vector<32x64xf32>
    %16 = arith.truncf %15 : vector<32x64xf32> to vector<32x64xbf16>
    %17 = vector.extract_strided_slice %14 {offsets = [32, 0], sizes = [32, 64], strides = [1, 1]} : vector<64x64xf32> to vector<32x64xf32>
    %18 = arith.truncf %17 : vector<32x64xf32> to vector<32x64xbf16>
    %19 = vector.extract_strided_slice %9 {offsets = [0, 0], sizes = [4, 128], strides = [1, 1]} : vector<32x128xbf16> to vector<4x128xbf16>
    %20 = vector.extract_strided_slice %16 {offsets = [0, 0], sizes = [4, 64], strides = [1, 1]} : vector<32x64xbf16> to vector<4x64xbf16>
    %21 = vector.extract_strided_slice %18 {offsets = [0, 0], sizes = [4, 64], strides = [1, 1]} : vector<32x64xbf16> to vector<4x64xbf16>
    %cst_14 = arith.constant dense<0.000000e+00> : vector<64x128xf32>
    %22 = tpu.matmul %20, %19, %cst_14 {dimension_numbers = #tpu.dot_dimension_numbers<[0], [0], [1], [1], [0, 1, 1, 1], [], []>} : vector<4x64xbf16>, vector<4x128xbf16>, vector<64x128xf32> -> vector<64x128xf32>
    %cst_15 = arith.constant dense<0xFF800000> : vector<128xf32>
    %23 = vector.multi_reduction <maximumf>, %22, %cst_15 [0] : vector<64x128xf32> to vector<128xf32>
    %24 = vector.shape_cast %23 : vector<128xf32> to vector<1x128xf32>
    %25 = vector.broadcast %24 : vector<1x128xf32> to vector<64x128xf32>
    %26 = arith.subf %22, %25 : vector<64x128xf32>
    %27 = math.exp %26 : vector<64x128xf32>
    %cst_16 = arith.constant dense<0.000000e+00> : vector<128xf32>
    %28 = vector.multi_reduction <add>, %27, %cst_16 [0] : vector<64x128xf32> to vector<128xf32>
    %29 = vector.shape_cast %28 : vector<128xf32> to vector<1x128xf32>
    %30 = arith.truncf %27 : vector<64x128xf32> to vector<64x128xbf16>
    %cst_17 = arith.constant dense<0.000000e+00> : vector<4x128xf32>
    %31 = tpu.matmul %21, %30, %cst_17 {dimension_numbers = #tpu.dot_dimension_numbers<[1], [0], [0], [1], [0, 0, 1, 1], [], []>} : vector<4x64xbf16>, vector<64x128xbf16>, vector<4x128xf32> -> vector<4x128xf32>
    %32 = tpu.reciprocal %29 {approx = true} : vector<1x128xf32> -> vector<1x128xf32>
    %33 = vector.broadcast %32 : vector<1x128xf32> to vector<4x128xf32>
    %34 = arith.mulf %31, %33 : vector<4x128xf32>
    %c0_18 = arith.constant 0 : index
    %c0_19 = arith.constant 0 : index
    %35 = vector.load %arg9[%c0_18, %c0_19] : memref<32x128xf32, #tpu.memory_space<vmem>>, vector<4x128xf32>
    tpu.vector_store %arg9[%c0_18, %c0_19], %34 {strides = array<i32>} : memref<32x128xf32, #tpu.memory_space<vmem>>, vector<4x128xf32>,
    %36 = vector.extract_strided_slice %9 {offsets = [4, 0], sizes = [4, 128], strides = [1, 1]} : vector<32x128xbf16> to vector<4x128xbf16>
    %37 = vector.extract_strided_slice %16 {offsets = [4, 0], sizes = [4, 64], strides = [1, 1]} : vector<32x64xbf16> to vector<4x64xbf16>
    %38 = vector.extract_strided_slice %18 {offsets = [4, 0], sizes = [4, 64], strides = [1, 1]} : vector<32x64xbf16> to vector<4x64xbf16>
    %cst_20 = arith.constant dense<0.000000e+00> : vector<64x128xf32>
    %39 = tpu.matmul %37, %36, %cst_20 {dimension_numbers = #tpu.dot_dimension_numbers<[0], [0], [1], [1], [0, 1, 1, 1], [], []>} : vector<4x64xbf16>, vector<4x128xbf16>, vector<64x128xf32> -> vector<64x128xf32>
    %cst_21 = arith.constant dense<0xFF800000> : vector<128xf32>
    %40 = vector.multi_reduction <maximumf>, %39, %cst_21 [0] : vector<64x128xf32> to vector<128xf32>
    %41 = vector.shape_cast %40 : vector<128xf32> to vector<1x128xf32>
    %42 = vector.broadcast %41 : vector<1x128xf32> to vector<64x128xf32>
    %43 = arith.subf %39, %42 : vector<64x128xf32>
    %44 = math.exp %43 : vector<64x128xf32>
    %cst_22 = arith.constant dense<0.000000e+00> : vector<128xf32>
    %45 = vector.multi_reduction <add>, %44, %cst_22 [0] : vector<64x128xf32> to vector<128xf32>
    %46 = vector.shape_cast %45 : vector<128xf32> to vector<1x128xf32>
    %47 = arith.truncf %44 : vector<64x128xf32> to vector<64x128xbf16>
    %cst_23 = arith.constant dense<0.000000e+00> : vector<4x128xf32>
    %48 = tpu.matmul %38, %47, %cst_23 {dimension_numbers = #tpu.dot_dimension_numbers<[1], [0], [0], [1], [0, 0, 1, 1], [], []>} : vector<4x64xbf16>, vector<64x128xbf16>, vector<4x128xf32> -> vector<4x128xf32>
    %49 = tpu.reciprocal %46 {approx = true} : vector<1x128xf32> -> vector<1x128xf32>
    %50 = vector.broadcast %49 : vector<1x128xf32> to vector<4x128xf32>
    %51 = arith.mulf %48, %50 : vector<4x128xf32>
    %c4 = arith.constant 4 : index
    %c0_24 = arith.constant 0 : index
    %52 = vector.load %arg9[%c4, %c0_24] : memref<32x128xf32, #tpu.memory_space<vmem>>, vector<4x128xf32>
    tpu.vector_store %arg9[%c4, %c0_24], %51 {strides = array<i32>} : memref<32x128xf32, #tpu.memory_space<vmem>>, vector<4x128xf32>,
    %53 = vector.extract_strided_slice %9 {offsets = [8, 0], sizes = [4, 128], strides = [1, 1]} : vector<32x128xbf16> to vector<4x128xbf16>
    %54 = vector.extract_strided_slice %16 {offsets = [8, 0], sizes = [4, 64], strides = [1, 1]} : vector<32x64xbf16> to vector<4x64xbf16>
    %55 = vector.extract_strided_slice %18 {offsets = [8, 0], sizes = [4, 64], strides = [1, 1]} : vector<32x64xbf16> to vector<4x64xbf16>
    %cst_25 = arith.constant dense<0.000000e+00> : vector<64x128xf32>
    %56 = tpu.matmul %54, %53, %cst_25 {dimension_numbers = #tpu.dot_dimension_numbers<[0], [0], [1], [1], [0, 1, 1, 1], [], []>} : vector<4x64xbf16>, vector<4x128xbf16>, vector<64x128xf32> -> vector<64x128xf32>
    %cst_26 = arith.constant dense<0xFF800000> : vector<128xf32>
    %57 = vector.multi_reduction <maximumf>, %56, %cst_26 [0] : vector<64x128xf32> to vector<128xf32>
    %58 = vector.shape_cast %57 : vector<128xf32> to vector<1x128xf32>
    %59 = vector.broadcast %58 : vector<1x128xf32> to vector<64x128xf32>
    %60 = arith.subf %56, %59 : vector<64x128xf32>
    %61 = math.exp %60 : vector<64x128xf32>
    %cst_27 = arith.constant dense<0.000000e+00> : vector<128xf32>
    %62 = vector.multi_reduction <add>, %61, %cst_27 [0] : vector<64x128xf32> to vector<128xf32>
    %63 = vector.shape_cast %62 : vector<128xf32> to vector<1x128xf32>
    %64 = arith.truncf %61 : vector<64x128xf32> to vector<64x128xbf16>
    %cst_28 = arith.constant dense<0.000000e+00> : vector<4x128xf32>
    %65 = tpu.matmul %55, %64, %cst_28 {dimension_numbers = #tpu.dot_dimension_numbers<[1], [0], [0], [1], [0, 0, 1, 1], [], []>} : vector<4x64xbf16>, vector<64x128xbf16>, vector<4x128xf32> -> vector<4x128xf32>
    %66 = tpu.reciprocal %63 {approx = true} : vector<1x128xf32> -> vector<1x128xf32>
    %67 = vector.broadcast %66 : vector<1x128xf32> to vector<4x128xf32>
    %68 = arith.mulf %65, %67 : vector<4x128xf32>
    %c8 = arith.constant 8 : index
    %c0_29 = arith.constant 0 : index
    %69 = vector.load %arg9[%c8, %c0_29] : memref<32x128xf32, #tpu.memory_space<vmem>>, vector<4x128xf32>
    tpu.vector_store %arg9[%c8, %c0_29], %68 {strides = array<i32>} : memref<32x128xf32, #tpu.memory_space<vmem>>, vector<4x128xf32>,
    %70 = vector.extract_strided_slice %9 {offsets = [12, 0], sizes = [4, 128], strides = [1, 1]} : vector<32x128xbf16> to vector<4x128xbf16>
    %71 = vector.extract_strided_slice %16 {offsets = [12, 0], sizes = [4, 64], strides = [1, 1]} : vector<32x64xbf16> to vector<4x64xbf16>
    %72 = vector.extract_strided_slice %18 {offsets = [12, 0], sizes = [4, 64], strides = [1, 1]} : vector<32x64xbf16> to vector<4x64xbf16>
    %cst_30 = arith.constant dense<0.000000e+00> : vector<64x128xf32>
    %73 = tpu.matmul %71, %70, %cst_30 {dimension_numbers = #tpu.dot_dimension_numbers<[0], [0], [1], [1], [0, 1, 1, 1], [], []>} : vector<4x64xbf16>, vector<4x128xbf16>, vector<64x128xf32> -> vector<64x128xf32>
    %cst_31 = arith.constant dense<0xFF800000> : vector<128xf32>
    %74 = vector.multi_reduction <maximumf>, %73, %cst_31 [0] : vector<64x128xf32> to vector<128xf32>
    %75 = vector.shape_cast %74 : vector<128xf32> to vector<1x128xf32>
    %76 = vector.broadcast %75 : vector<1x128xf32> to vector<64x128xf32>
    %77 = arith.subf %73, %76 : vector<64x128xf32>
    %78 = math.exp %77 : vector<64x128xf32>
    %cst_32 = arith.constant dense<0.000000e+00> : vector<128xf32>
    %79 = vector.multi_reduction <add>, %78, %cst_32 [0] : vector<64x128xf32> to vector<128xf32>
    %80 = vector.shape_cast %79 : vector<128xf32> to vector<1x128xf32>
    %81 = arith.truncf %78 : vector<64x128xf32> to vector<64x128xbf16>
    %cst_33 = arith.constant dense<0.000000e+00> : vector<4x128xf32>
    %82 = tpu.matmul %72, %81, %cst_33 {dimension_numbers = #tpu.dot_dimension_numbers<[1], [0], [0], [1], [0, 0, 1, 1], [], []>} : vector<4x64xbf16>, vector<64x128xbf16>, vector<4x128xf32> -> vector<4x128xf32>
    %83 = tpu.reciprocal %80 {approx = true} : vector<1x128xf32> -> vector<1x128xf32>
    %84 = vector.broadcast %83 : vector<1x128xf32> to vector<4x128xf32>
    %85 = arith.mulf %82, %84 : vector<4x128xf32>
    %c12 = arith.constant 12 : index
    %c0_34 = arith.constant 0 : index
    %86 = vector.load %arg9[%c12, %c0_34] : memref<32x128xf32, #tpu.memory_space<vmem>>, vector<4x128xf32>
    tpu.vector_store %arg9[%c12, %c0_34], %85 {strides = array<i32>} : memref<32x128xf32, #tpu.memory_space<vmem>>, vector<4x128xf32>,
    %87 = vector.extract_strided_slice %9 {offsets = [16, 0], sizes = [4, 128], strides = [1, 1]} : vector<32x128xbf16> to vector<4x128xbf16>
    %88 = vector.extract_strided_slice %16 {offsets = [16, 0], sizes = [4, 64], strides = [1, 1]} : vector<32x64xbf16> to vector<4x64xbf16>
    %89 = vector.extract_strided_slice %18 {offsets = [16, 0], sizes = [4, 64], strides = [1, 1]} : vector<32x64xbf16> to vector<4x64xbf16>
    %cst_35 = arith.constant dense<0.000000e+00> : vector<64x128xf32>
    %90 = tpu.matmul %88, %87, %cst_35 {dimension_numbers = #tpu.dot_dimension_numbers<[0], [0], [1], [1], [0, 1, 1, 1], [], []>} : vector<4x64xbf16>, vector<4x128xbf16>, vector<64x128xf32> -> vector<64x128xf32>
    %cst_36 = arith.constant dense<0xFF800000> : vector<128xf32>
    %91 = vector.multi_reduction <maximumf>, %90, %cst_36 [0] : vector<64x128xf32> to vector<128xf32>
    %92 = vector.shape_cast %91 : vector<128xf32> to vector<1x128xf32>
    %93 = vector.broadcast %92 : vector<1x128xf32> to vector<64x128xf32>
    %94 = arith.subf %90, %93 : vector<64x128xf32>
    %95 = math.exp %94 : vector<64x128xf32>
    %cst_37 = arith.constant dense<0.000000e+00> : vector<128xf32>
    %96 = vector.multi_reduction <add>, %95, %cst_37 [0] : vector<64x128xf32> to vector<128xf32>
    %97 = vector.shape_cast %96 : vector<128xf32> to vector<1x128xf32>
    %98 = arith.truncf %95 : vector<64x128xf32> to vector<64x128xbf16>
    %cst_38 = arith.constant dense<0.000000e+00> : vector<4x128xf32>
    %99 = tpu.matmul %89, %98, %cst_38 {dimension_numbers = #tpu.dot_dimension_numbers<[1], [0], [0], [1], [0, 0, 1, 1], [], []>} : vector<4x64xbf16>, vector<64x128xbf16>, vector<4x128xf32> -> vector<4x128xf32>
    %100 = tpu.reciprocal %97 {approx = true} : vector<1x128xf32> -> vector<1x128xf32>
    %101 = vector.broadcast %100 : vector<1x128xf32> to vector<4x128xf32>
    %102 = arith.mulf %99, %101 : vector<4x128xf32>
    %c16 = arith.constant 16 : index
    %c0_39 = arith.constant 0 : index
    %103 = vector.load %arg9[%c16, %c0_39] : memref<32x128xf32, #tpu.memory_space<vmem>>, vector<4x128xf32>
    tpu.vector_store %arg9[%c16, %c0_39], %102 {strides = array<i32>} : memref<32x128xf32, #tpu.memory_space<vmem>>, vector<4x128xf32>,
    %104 = vector.extract_strided_slice %9 {offsets = [20, 0], sizes = [4, 128], strides = [1, 1]} : vector<32x128xbf16> to vector<4x128xbf16>
    %105 = vector.extract_strided_slice %16 {offsets = [20, 0], sizes = [4, 64], strides = [1, 1]} : vector<32x64xbf16> to vector<4x64xbf16>
    %106 = vector.extract_strided_slice %18 {offsets = [20, 0], sizes = [4, 64], strides = [1, 1]} : vector<32x64xbf16> to vector<4x64xbf16>
    %cst_40 = arith.constant dense<0.000000e+00> : vector<64x128xf32>
    %107 = tpu.matmul %105, %104, %cst_40 {dimension_numbers = #tpu.dot_dimension_numbers<[0], [0], [1], [1], [0, 1, 1, 1], [], []>} : vector<4x64xbf16>, vector<4x128xbf16>, vector<64x128xf32> -> vector<64x128xf32>
    %cst_41 = arith.constant dense<0xFF800000> : vector<128xf32>
    %108 = vector.multi_reduction <maximumf>, %107, %cst_41 [0] : vector<64x128xf32> to vector<128xf32>
    %109 = vector.shape_cast %108 : vector<128xf32> to vector<1x128xf32>
    %110 = vector.broadcast %109 : vector<1x128xf32> to vector<64x128xf32>
    %111 = arith.subf %107, %110 : vector<64x128xf32>
    %112 = math.exp %111 : vector<64x128xf32>
    %cst_42 = arith.constant dense<0.000000e+00> : vector<128xf32>
    %113 = vector.multi_reduction <add>, %112, %cst_42 [0] : vector<64x128xf32> to vector<128xf32>
    %114 = vector.shape_cast %113 : vector<128xf32> to vector<1x128xf32>
    %115 = arith.truncf %112 : vector<64x128xf32> to vector<64x128xbf16>
    %cst_43 = arith.constant dense<0.000000e+00> : vector<4x128xf32>
    %116 = tpu.matmul %106, %115, %cst_43 {dimension_numbers = #tpu.dot_dimension_numbers<[1], [0], [0], [1], [0, 0, 1, 1], [], []>} : vector<4x64xbf16>, vector<64x128xbf16>, vector<4x128xf32> -> vector<4x128xf32>
    %117 = tpu.reciprocal %114 {approx = true} : vector<1x128xf32> -> vector<1x128xf32>
    %118 = vector.broadcast %117 : vector<1x128xf32> to vector<4x128xf32>
    %119 = arith.mulf %116, %118 : vector<4x128xf32>
    %c20 = arith.constant 20 : index
    %c0_44 = arith.constant 0 : index
    %120 = vector.load %arg9[%c20, %c0_44] : memref<32x128xf32, #tpu.memory_space<vmem>>, vector<4x128xf32>
    tpu.vector_store %arg9[%c20, %c0_44], %119 {strides = array<i32>} : memref<32x128xf32, #tpu.memory_space<vmem>>, vector<4x128xf32>,
    %121 = vector.extract_strided_slice %9 {offsets = [24, 0], sizes = [4, 128], strides = [1, 1]} : vector<32x128xbf16> to vector<4x128xbf16>
    %122 = vector.extract_strided_slice %16 {offsets = [24, 0], sizes = [4, 64], strides = [1, 1]} : vector<32x64xbf16> to vector<4x64xbf16>
    %123 = vector.extract_strided_slice %18 {offsets = [24, 0], sizes = [4, 64], strides = [1, 1]} : vector<32x64xbf16> to vector<4x64xbf16>
    %cst_45 = arith.constant dense<0.000000e+00> : vector<64x128xf32>
    %124 = tpu.matmul %122, %121, %cst_45 {dimension_numbers = #tpu.dot_dimension_numbers<[0], [0], [1], [1], [0, 1, 1, 1], [], []>} : vector<4x64xbf16>, vector<4x128xbf16>, vector<64x128xf32> -> vector<64x128xf32>
    %cst_46 = arith.constant dense<0xFF800000> : vector<128xf32>
    %125 = vector.multi_reduction <maximumf>, %124, %cst_46 [0] : vector<64x128xf32> to vector<128xf32>
    %126 = vector.shape_cast %125 : vector<128xf32> to vector<1x128xf32>
    %127 = vector.broadcast %126 : vector<1x128xf32> to vector<64x128xf32>
    %128 = arith.subf %124, %127 : vector<64x128xf32>
    %129 = math.exp %128 : vector<64x128xf32>
    %cst_47 = arith.constant dense<0.000000e+00> : vector<128xf32>
    %130 = vector.multi_reduction <add>, %129, %cst_47 [0] : vector<64x128xf32> to vector<128xf32>
    %131 = vector.shape_cast %130 : vector<128xf32> to vector<1x128xf32>
    %132 = arith.truncf %129 : vector<64x128xf32> to vector<64x128xbf16>
    %cst_48 = arith.constant dense<0.000000e+00> : vector<4x128xf32>
    %133 = tpu.matmul %123, %132, %cst_48 {dimension_numbers = #tpu.dot_dimension_numbers<[1], [0], [0], [1], [0, 0, 1, 1], [], []>} : vector<4x64xbf16>, vector<64x128xbf16>, vector<4x128xf32> -> vector<4x128xf32>
    %134 = tpu.reciprocal %131 {approx = true} : vector<1x128xf32> -> vector<1x128xf32>
    %135 = vector.broadcast %134 : vector<1x128xf32> to vector<4x128xf32>
    %136 = arith.mulf %133, %135 : vector<4x128xf32>
    %c24 = arith.constant 24 : index
    %c0_49 = arith.constant 0 : index
    %137 = vector.load %arg9[%c24, %c0_49] : memref<32x128xf32, #tpu.memory_space<vmem>>, vector<4x128xf32>
    tpu.vector_store %arg9[%c24, %c0_49], %136 {strides = array<i32>} : memref<32x128xf32, #tpu.memory_space<vmem>>, vector<4x128xf32>,
    %138 = vector.extract_strided_slice %9 {offsets = [28, 0], sizes = [4, 128], strides = [1, 1]} : vector<32x128xbf16> to vector<4x128xbf16>
    %139 = vector.extract_strided_slice %16 {offsets = [28, 0], sizes = [4, 64], strides = [1, 1]} : vector<32x64xbf16> to vector<4x64xbf16>
    %140 = vector.extract_strided_slice %18 {offsets = [28, 0], sizes = [4, 64], strides = [1, 1]} : vector<32x64xbf16> to vector<4x64xbf16>
    %cst_50 = arith.constant dense<0.000000e+00> : vector<64x128xf32>
    %141 = tpu.matmul %139, %138, %cst_50 {dimension_numbers = #tpu.dot_dimension_numbers<[0], [0], [1], [1], [0, 1, 1, 1], [], []>} : vector<4x64xbf16>, vector<4x128xbf16>, vector<64x128xf32> -> vector<64x128xf32>
    %cst_51 = arith.constant dense<0xFF800000> : vector<128xf32>
    %142 = vector.multi_reduction <maximumf>, %141, %cst_51 [0] : vector<64x128xf32> to vector<128xf32>
    %143 = vector.shape_cast %142 : vector<128xf32> to vector<1x128xf32>
    %144 = vector.broadcast %143 : vector<1x128xf32> to vector<64x128xf32>
    %145 = arith.subf %141, %144 : vector<64x128xf32>
    %146 = math.exp %145 : vector<64x128xf32>
    %cst_52 = arith.constant dense<0.000000e+00> : vector<128xf32>
    %147 = vector.multi_reduction <add>, %146, %cst_52 [0] : vector<64x128xf32> to vector<128xf32>
    %148 = vector.shape_cast %147 : vector<128xf32> to vector<1x128xf32>
    %149 = arith.truncf %146 : vector<64x128xf32> to vector<64x128xbf16>
    %cst_53 = arith.constant dense<0.000000e+00> : vector<4x128xf32>
    %150 = tpu.matmul %140, %149, %cst_53 {dimension_numbers = #tpu.dot_dimension_numbers<[1], [0], [0], [1], [0, 0, 1, 1], [], []>} : vector<4x64xbf16>, vector<64x128xbf16>, vector<4x128xf32> -> vector<4x128xf32>
    %151 = tpu.reciprocal %148 {approx = true} : vector<1x128xf32> -> vector<1x128xf32>
    %152 = vector.broadcast %151 : vector<1x128xf32> to vector<4x128xf32>
    %153 = arith.mulf %150, %152 : vector<4x128xf32>
    %c28 = arith.constant 28 : index
    %c0_54 = arith.constant 0 : index
    %154 = vector.load %arg9[%c28, %c0_54] : memref<32x128xf32, #tpu.memory_space<vmem>>, vector<4x128xf32>
    tpu.vector_store %arg9[%c28, %c0_54], %153 {strides = array<i32>} : memref<32x128xf32, #tpu.memory_space<vmem>>, vector<4x128xf32>,
    %c0_55 = arith.constant 0 : index
    %c0_56 = arith.constant 0 : index
    %155 = vector.load %arg9[%c0_55, %c0_56] : memref<32x128xf32, #tpu.memory_space<vmem>>, vector<32x128xf32>
    %c0_57 = arith.constant 0 : index
    %c0_58 = arith.constant 0 : index
    %c0_59 = arith.constant 0 : index
    %156 = vector.load %arg8[%c0_57, %c0_58, %c0_59] : memref<1x32x128xf32, #tpu.memory_space<vmem>>, vector<1x32x128xf32>
    %157 = vector.shape_cast %156 : vector<1x32x128xf32> to vector<32x128xf32>
    %158 = vector.shape_cast %155 : vector<32x128xf32> to vector<1x32x128xf32>
    tpu.vector_store %arg8[%c0_57, %c0_58, %c0_59], %158 {strides = array<i32>} : memref<1x32x128xf32, #tpu.memory_space<vmem>>, vector<1x32x128xf32>,
    return
  }
  func.func @transform_0(%arg0: i32, %arg1: i32) -> (i32, i32, i32) {
    %c0_i32 = arith.constant 0 : i32
    %c0_i32_0 = arith.constant 0 : i32
    return %arg0, %c0_i32, %arg1 : i32, i32, i32
  }
  func.func @transform_1(%arg0: i32, %arg1: i32) -> (i32, i32, i32) {
    %c0_i32 = arith.constant 0 : i32
    %c0_i32_0 = arith.constant 0 : i32
    %c0_i32_1 = arith.constant 0 : i32
    return %arg0, %c0_i32, %c0_i32_0 : i32, i32, i32
  }
  func.func @transform_2(%arg0: i32, %arg1: i32) -> (i32, i32) {
    %c0_i32 = arith.constant 0 : i32
    %c0_i32_0 = arith.constant 0 : i32
    %c0_i32_1 = arith.constant 0 : i32
    return %c0_i32, %c0_i32_0 : i32, i32
  }
  func.func @transform_3(%arg0: i32, %arg1: i32) -> (i32, i32) {
    %c0_i32 = arith.constant 0 : i32
    %c0_i32_0 = arith.constant 0 : i32
    %c0_i32_1 = arith.constant 0 : i32
    return %c0_i32, %c0_i32_0 : i32, i32
  }
  func.func @transform_4(%arg0: i32, %arg1: i32) -> (i32, i32) {
    %c0_i32 = arith.constant 0 : i32
    %c0_i32_0 = arith.constant 0 : i32
    %c0_i32_1 = arith.constant 0 : i32
    return %c0_i32, %c0_i32_0 : i32, i32
  }
  func.func @transform_5(%arg0: i32, %arg1: i32) -> (i32, i32) {
    %c0_i32 = arith.constant 0 : i32
    %c0_i32_0 = arith.constant 0 : i32
    %c0_i32_1 = arith.constant 0 : i32
    return %c0_i32, %c0_i32_0 : i32, i32
  }
  func.func @transform_6(%arg0: i32, %arg1: i32) -> (i32, i32, i32) {
    %c0_i32 = arith.constant 0 : i32
    %c0_i32_0 = arith.constant 0 : i32
    return %arg0, %c0_i32, %arg1 : i32, i32, i32
  }
}

</mosaic_0001>

<bundles_post_ra>
// kernel: tpu_custom_call.1
= control target key start
LH: loop header
LB: loop body
LE: loop exit
PB: predicated region body
PF: predicated region fallthrough
CT: control target
= control target key end

     0   :  { %s3705_s0 = inlined_call_operand.vmem [shape: bf16[2,32,256], index: 0, kind: input, shape index: {}]   ;;  %s3706_s1 = inlined_call_operand.vmem [shape: bf16[2,32,64], index: 1, kind: input, shape index: {}]   ;;  %s3707_s2 = inlined_call_operand.vmem [shape: bf16[32,32], index: 2, kind: input, shape index: {}]   ;;  %s3708_s3 = inlined_call_operand.vmem [shape: f32[32,1], index: 3, kind: input, shape index: {}]   ;;  %s3709_s4 = inlined_call_operand.vmem [shape: bf16[64,32], index: 4, kind: input, shape index: {}]   ;;  %s3710_s5 = inlined_call_operand.vmem [shape: f32[64,1], index: 5, kind: input, shape index: {}]   ;;  %s3711_s6 = inlined_call_operand.hbm [shape: f32[2,32,256], index: 6, kind: output, shape index: {}]  }
   0x1   :  { %3712 = sst [smem:[#allocation7_spill]] %s3705_s0 }
   0x2   :  { %11 = vsyncpa [#allocation5], 0 }
   0x3   :  { %13 = vsyncpa [#allocation5 + $0x1], 0  ;;  %s3085_s21 = smov 0   ;;  %s3087_s22 = smov 0  }
   0x4   :  { %s3089_s23 = smov 0   ;;  %s3091_s24 = smov 0  }
   0x5   :  { %s3093_s25 = smov 0   ;;  %s3095_s26 = smov 0  }
   0x6   :  { %s3097_s27 = smov 0   ;;  %s3099_s28 = smov 0  }
   0x7 LB: > { %s2346_s29 = sadd.s32 4294967295, %s3041_s28   ;;  %s2347_s30 = sadd.s32 4294967294, %s3041_s28   ;;  %s3041_s28 = sphi %s3099_s28, %s19_s28   ;;  %s3037_s27 = sphi %s3097_s27, %s3723_s27   ;;  %s3033_s26 = sphi %s3095_s26, %s3722_s26   ;;  %s3029_s25 = sphi %s3093_s25, %s3721_s25   ;;  %s3025_s24 = sphi %s3091_s24, %s3720_s24   ;;  %s3021_s23 = sphi %s3089_s23, %s3719_s23   ;;  %s3017_s22 = sphi %s3087_s22, %s3718_s22   ;;  %s3013_s21 = sphi %s3085_s21, %s3717_s21  }
   0x8   : > { %s28_s7 = sadd.s32 1, %s3033_s26  ;;  %s31_s8 = sadd.s32 1, %s3037_s27 }
   0x9   : > { %p29_p0 = scmp.ge.s32.totalorder %s28_s7, 2  ;;  %p47_p1 = scmp.ne.s32.totalorder %s3021_s23, %s3017_s22 }
   0xa   : > { %p48_p2 = scmp.eq.s32.totalorder %s3041_s28, 0  ;;  %p189_p5 = scmp.eq.s32.totalorder %s2346_s29, 3 }
   0xb   : > { %s3725_s7 = smov (%p29_p0, %s28_s7), 0  ;;  %s3727_s8 = smov (!%p29_p0, %s31_s8), %s3037_s27 }
   0xc   : > { %s36_s9 = ssub.s32 %s3033_s26, %s3725_s7  ;;  %p3137_p3 = por %p48_p2, %p47_p1 }
   0xd   : > { %p33_p4 = scmp.ge.s32.totalorder %s3727_s8, 2  ;;  %p194_p6 = scmp.ne.s32.totalorder %s3017_s22, %s3013_s21 }
   0xe   : > { %p195_p7 = scmp.eq.s32.totalorder %s2347_s30, 3  ;;  %p3145_p8 = por %p189_p5, %p47_p1 }
   0xf   : > { %s3729_s8 = smov (%p33_p4, %s3727_s8), 0  ;;  %s40_s15 = sadd.s32 1, %s3021_s23 }
  0x10   : > { %p3149_p9 = por %p195_p7, %p194_p6  ;;  %s35_s13 = ssub.s32 %s3037_s27, %s3729_s8 }
  0x11   : > { %s37_s14 = sor.u32 %s36_s9, %s35_s13  ;;  %p2349_p11 = scmp.ge.s32.totalorder %s3041_s28, 4 }
  0x12   : > { %p38_p10 = scmp.eq.s32.totalorder %s37_s14, 0 }
  0x13   : > { %223 = sbr.rel (%p2349_p11) target bundleno = 38 (0x26), region = 32 }
  0x14   : > { %s3157_s16 = scalar_select %p38_p10, %s3021_s23, %s40_s15  }
  0x1a   : > { %226 = sbr.rel (!%p3137_p3) target bundleno = 38 (0x26), region = 36  ;;  %s228_s17 = sand.u32 (%p3137_p3), 1, %s3021_s23  }
  0x1b   : > { %s2351_s18 = sshll.u32 (%p3137_p3), %s3037_s27, 3  ;;  %s2350_s19 = sshll.u32 (%p3137_p3), %s228_s17, 4 }
  0x1c   : > { %s232_s20 = sadd.s32 (%p3137_p3), %s3033_s26, %s2351_s18  ;;  %s3716_s0 = sld [smem:[#allocation7_spill]] (%p3137_p3) }
  0x1d   : > { %s2352_s29 = sshll.u32 (%p3137_p3), %s232_s20, 2  ;;  %s230_s14 = scalar_lea.vmem (%p3137_p3), [#allocation3], %s2350_s19 }
  0x22   : > { %s234_s13 = scalar_lea.vmem %s3716_s0, %s2352_s29 }
  0x23   : > { %v250_v0 = vld [vmem:[%s234_s13] sm:$0xf]  ;;  %v252_v1 = vld [vmem:[%s234_s13 + $0x8] sm:$0xf]  ;;  %v254_v2 = vld [vmem:[%s234_s13 + $0x10] sm:$0xf] }
  0x24   : > { %251 = vst [vmem:[%s230_s14] sm:$0xf] %v250_v0  ;;  %253 = vst [vmem:[%s230_s14 + $0x4] sm:$0xf] %v252_v1  ;;  %v256_v3 = vld [vmem:[%s234_s13 + $0x18] sm:$0xf] }
  0x25   : > { %255 = vst [vmem:[%s230_s14 + $0x8] sm:$0xf] %v254_v2  ;;  %257 = vst [vmem:[%s230_s14 + $0xc] sm:$0xf] %v256_v3 }
  0x26 PF: > { %p2353_p12 = scmp.ge.s32.totalorder %s3041_s28, 1  ;;  %p295_p13 = scmp.lt.s32.totalorder %s3041_s28, 5 }
  0x28   : > { %p296_p0 = pnand %p2353_p12, %p295_p13 }
  0x29   : > { %p336_p1 = scmp.lt.s32.totalorder (!%p296_p0), %s3029_s25, 1  ;;  %vm400_vm0 = vcmask (!%p296_p0), 261120   ;;  %v2795_v4 = vld [vmem:[%s3709_s4] sm:$0xff] (!%p296_p0)   ;;  %s3175_s17 = sand.u32 (!%p296_p0), 1, %s3017_s22   ;;  %v3043_v6 = vmov (!%p296_p0), 0   ;;  %v467_v13 = vld [vmem:[%s3710_s5 + $0x8] sm:$0xff] (!%p296_p0) }
  0x2a   : > { %299 = sbr.rel (%p296_p0) target bundleno = 1038 (0x40e), region = 81  ;;  %v2799_v5 = vld [vmem:[%s3707_s2] sm:$0xff] (!%p296_p0)   ;;  %2522 = vmatprep.mubr.msk.bf16.mxu1 (!%p296_p0), %vm400_vm0, %v2795_v4  ;;  %s2354_s29 = sshll.u32 (!%p296_p0), %s3175_s17, 4  ;;  %2791 = vset.pattern.permute.xlu0 (!%p296_p0), %v3043_v6  ;;  %v2800_v14 = vld [vmem:[%s3707_s2 + $0x8] sm:$0xff] (!%p296_p0)   ;;  %v468_v17 = vld [vmem:[%s3710_s5 + $0x10] sm:$0xff] (!%p296_p0)  ;;  %vm656_vm1 = vcmask (!%p296_p0), 1041408  }
  0x2b   : > { %v466_v7 = vld [vmem:[%s3710_s5] sm:$0xff] (!%p296_p0)  ;;  %2514 = vmatprep.mubr.msk.bf16.mxu0 (!%p296_p0), %vm400_vm0, %v2799_v5  ;;  %s304_s0 = scalar_lea.vmem (!%p296_p0), [#allocation3], %s2354_s29  ;;  %2792 = vset.pattern.permute.xlu1 (!%p296_p0), %v3043_v6  ;;  %v2796_v15 = vld [vmem:[%s3709_s4 + $0x8] sm:$0xff] (!%p296_p0)   ;;  %v469_v18 = vld [vmem:[%s3710_s5 + $0x18] sm:$0xff] (!%p296_p0)  ;;  %vm643_vm2 = vcmask (!%p296_p0), 31744   ;;  %vm3045_vm3 = vmmov (!%p296_p0), 0  }
  0x2c   : > { %476 = vperm.xlu0 (!%p296_p0), %2791, %v466_v7   ;;  %v2797_v8 = vld [vmem:[%s304_s0] sm:$0xff] (!%p296_p0)   ;;  %v2798_v11 = vld [vmem:[%s304_s0 + $0x8] sm:$0xff] (!%p296_p0)   ;;  %vm779_vm4 = vcmask (!%p296_p0), 523264   ;;  %s2355_s0 = sshll.u32 (!%p296_p0), %s3175_s17, 5 }
  0x2d   : > { %2510 = vmatprep.subr.bf16.mxu0 (!%p296_p0), %v2797_v8  ;;  %v354_v12 = vld [vmem:[%s3708_s3] sm:$0xff] (!%p296_p0)  ;;  %v355_v16 = vld [vmem:[%s3708_s3 + $0x8] sm:$0xff] (!%p296_p0)  ;;  %v2801_v19 = vld [vmem:[%s3709_s4 + $0x10] sm:$0xff] (!%p296_p0)   ;;  %s3627_s10 = scalar_lea.vmem (!%p296_p0), [#allocation4], %s2355_s0 }
  0x2e   : > { %2511 = vmatpush3.bf16.msra.mxu0 (!%p296_p0), %v2797_v8  ;;  %360 = vperm.xlu1 (!%p296_p0), %2792, %v354_v12   ;;  %v2802_v20 = vld [vmem:[%s3709_s4 + $0x18] sm:$0xff] (!%p296_p0)   ;;  %v356_v48 = vld [vmem:[%s3708_s3 + $0x10] sm:$0xff] (!%p296_p0)  ;;  %v471_v58 = vld [vmem:[%s3710_s5 + $0x28] sm:$0xff] (!%p296_p0)  ;;  %s2251_s20 = sshll.u32 (!%p296_p0), %s3627_s10, 4  ;;  %s3645_s20 = int_to_ptr.vmem [resolvable:$true] %s2251_s20 }
  0x2f   : > { %2512 = vmatprep.subr.bf16.mxu0 (!%p296_p0), %v2798_v11  ;;  %v357_v47 = vld [vmem:[%s3708_s3 + $0x18] sm:$0xff] (!%p296_p0)  ;;  %v470_v59 = vld [vmem:[%s3710_s5 + $0x20] sm:$0xff] (!%p296_p0)  ;;  %v472_v61 = vld [vmem:[%s3710_s5 + $0x30] sm:$0xff] (!%p296_p0) }
  0x30   : > { %481 = vperm.xlu0 (!%p296_p0), %2791, %v467_v13   ;;  %v473_v60 = vld [vmem:[%s3710_s5 + $0x38] sm:$0xff] (!%p296_p0) }
  0x31   : > { %s337_s18 = scalar_select %p336_p1, %s3029_s25, 1 }
  0x32   : > { %2513 = vmatpush3.bf16.msra.mxu0 %v2798_v11  ;;  %365 = vperm.xlu1 %2792, %v355_v16  }
  0x33   : > { %s2419_s13 = sshll.u32 %s337_s18, 4 }
  0x34   : > { %s340_s15 = scalar_lea.vmem %s3706_s1, %s2419_s13  ;;  %486 = vperm.xlu0 %2791, %v468_v17   ;;  %s2947_s13 = scalar_lea.vmem %s3645_s20, 512 }
  0x35   : > { %v2793_v9 = vld [vmem:[%s340_s15] sm:$0xff]   ;;  %v2794_v10 = vld [vmem:[%s340_s15 + $0x8] sm:$0xff]   ;;  %2515 = vmatmul.mubr.msk.bf16.vlgmr.msra.gmra.mrb[0].mxu0 %vm400_vm0, %v2800_v14  ;;  %s2415_s15 = sshll.u32 %s3029_s25, 3  ;;  %s2237_s25 = scalar_lea.sflag [#allocation5], %s3175_s17 }
  0x36   : > { %2518 = vmatprep.subr.bf16.mxu1 %v2793_v9  ;;  %491 = vperm.xlu1 %2792, %v469_v18   ;;  %s2248_s19 = sadd.s32 %s3025_s24, %s2415_s15  ;;  %p2948_p2 = scmp.ne.s32.totalorder %s3645_s20, %s2947_s13 }
  0x37   : > { %2519 = vmatpush3.bf16.msra.mxu1 %v2793_v9  ;;  %s2416_s18 = sshll.u32 %s2248_s19, 7  ;;  %s3046_s24 = smov [#allocation4]  }
  0x38   : > { %2520 = vmatprep.subr.bf16.mxu1 %v2794_v10  ;;  %s3650_s9 = scalar_lea.hbm %s3711_s6, %s2416_s18  ;;  %p2949_p3 = pnand %p2948_p2, %p3145_p8 }
  0x39   : > { %s2951_s14 = sshll.u32 %s3046_s24, 4  ;;  %s2952_s14 = int_to_ptr.vmem [resolvable:$false] %s2951_s14 }
  0x3a   : > { %p2950_p4 = pneg %p2949_p3  ;;  %s2953_s0 = scalar_lea.vmem %s2952_s14, 1024 }
  0x3b   : > { %2521 = vmatpush3.bf16.msra.mxu1 %v2794_v10  ;;  %p2954_p5 = scmp.lt.s32.totalorder %s3645_s20, %s2952_s14  ;;  %p2955_p6 = scmp.lt.s32.totalorder %s2953_s0, %s2947_s13 }
  0x3d   : > { %p2956_p7 = por %p2955_p6, %p2954_p5 }
  0x3e   : > { %2523 = vmatmul.mubr.msk.bf16.vlgmr.msra.gmra.mrb[0].mxu1 %vm400_vm0, %v2796_v15 }
  0x3f   : > { %2526 = vmatprep.mubr.msk.bf16.mxu1 %vm400_vm0, %v2801_v19  ;;  %p2957_p10 = pnand %p2956_p7, %p2950_p4 }
  0x46   : > { %2527 = vmatmul.mubr.msk.bf16.gmra.mrb[4].mxu1 %vm400_vm0, %v2802_v20 }
  0xab   : > { %v477_v21 = vpop.permute.xlu0 %476 }
  0xad   : > { %v361_v22 = vpop.permute.xlu1 %360 }
  0xaf   : > { %v482_v23 = vpop.permute.xlu0 %481 }
  0xb1   : > { %v366_v24 = vpop.permute.xlu1 %365 }
  0xb3   : > { %v487_v25 = vpop.permute.xlu0 %486 }
  0xb5   : > { %v492_v26 = vpop.permute.xlu1 %491 }
 0x108   : > { %v3221_v27 = vpop.f32.mrb[0].mxu0 }
 0x109   : > { %v441_v29 = vpop.f32.mrb[1].mxu0 }
 0x10a   : > { %v442_v31 = vadd.f32 %v441_v29, %v361_v22  ;;  %v3223_v32 = vpop.f32.mrb[2].mxu0 }
 0x10b   : > { %v444_v34 = vpop.f32.mrb[3].mxu0 }
 0x10c   : > { %v445_v38 = vadd.f32 %v444_v34, %v366_v24 }
 0x10e   : > { %v3225_v42 = vpack.c.bf16 %v445_v38, %v442_v31 }
 0x110   : > { %2706 = vmatprep.subr.msk.bf16.mxu0 %vm656_vm1, %v3225_v42  ;;  %v658_v44 = vsel %vm656_vm1, %v3225_v42, 0  ;;  %v846_v45 = vrot.slane %v3225_v42, 2  ;;  %v1047_v1 = vrot.slane %v3225_v42, 4  ;;  %v1247_v8 = vrot.slane %v3225_v42, 6 }
 0x111   : > { %v2524_v28 = vpop.f32.mrb[0].mxu1  ;;  %2531 = vmatpush3.bf16.msra.mxu0 %v658_v44 }
 0x112   : > { %v592_v30 = vpop.f32.mrb[1].mxu1  ;;  %v601_v35 = vadd.f32 %v2524_v28, %v487_v25  ;;  %2707 = vmatprep.subr.msk.bf16.mxu0 %vm656_vm1, %v846_v45  ;;  %v860_v0 = vsel %vm656_vm1, %v846_v45, 0  ;;  %v1061_v7 = vsel %vm656_vm1, %v1047_v1, 0  ;;  %v1261_v18 = vsel %vm656_vm1, %v1247_v8, 0 }
 0x113   : > { %v2525_v33 = vpop.f32.mrb[2].mxu1  ;;  %v593_v39 = vadd.f32 %v592_v30, %v477_v21 }
 0x114   : > { %v604_v36 = vadd.f32 %v2525_v33, %v492_v26  ;;  %v595_v37 = vpop.f32.mrb[3].mxu1 }
 0x115   : > { %v596_v40 = vadd.f32 %v595_v37, %v482_v23 }
 0x116   : > { %v624_v41 = vpack.c.bf16 %v604_v36, %v601_v35 }
 0x117   : > { %v623_v43 = vpack.c.bf16 %v596_v40, %v593_v39 }
 0x118   : > { %v1626_v51 = vrot.slane %v624_v41, 2  ;;  %v1828_v52 = vrot.slane %v624_v41, 4  ;;  %v2028_v53 = vrot.slane %v624_v41, 6 }
 0x119   : > { %627 = vxpose.xlu0.c.b16.start.end [1/1] (short) (narrow) %v623_v43, 64  ;;  %v827_v46 = vrot.slane %v623_v43, 2  ;;  %v1029_v49 = vrot.slane %v623_v43, 4  ;;  %v1229_v50 = vrot.slane %v623_v43, 6  ;;  %v3239_v54 = vpop.f32.mrb[4].mxu1 }
 0x11a   : > { %v3241_v55 = vpop.f32.mrb[5].mxu1 }
 0x11b   : > { %829 = vxpose.xlu1.c.b16.start.end [1/1] (short) (narrow) %v827_v46, 64  ;;  %v3243_v56 = vpop.f32.mrb[6].mxu1 }
 0x11c   : > { %v3245_v57 = vpop.f32.mrb[7].mxu1 }
 0x12b   : > { %375 = vperm.xlu1 %2792, %v357_v47  }
 0x12e   : > { %370 = vperm.xlu0 %2791, %v356_v48  }
 0x14c   : > { %1031 = vxpose.xlu0.c.b16.start.end [1/1] (short) (narrow) %v1029_v49, 64 }
 0x14e   : > { %1231 = vxpose.xlu1.c.b16.start.end [1/1] (short) (narrow) %v1229_v50, 64 }
 0x159   : > { %1429 = vxpose.xlu0.c.b16.start.end [1/1] (short) (narrow) %v624_v41, 64 }
 0x15b   : > { %1628 = vxpose.xlu1.c.b16.start.end [1/1] (short) (narrow) %v1626_v51, 64 }
 0x166   : > { %1830 = vxpose.xlu0.c.b16.start.end [1/1] (short) (narrow) %v1828_v52, 64 }
 0x168   : > { %2030 = vxpose.xlu1.c.b16.start.end [1/1] (short) (narrow) %v2028_v53, 64 }
 0x178   : > { %501 = vperm.xlu1 %2792, %v471_v58  }
 0x17b   : > { %496 = vperm.xlu0 %2791, %v470_v59  }
 0x17c   : > { %511 = vperm.xlu1 %2792, %v473_v60  }
 0x17f   : > { %v635_v62 = vpop.trf.xlu0  ;;  %506 = vperm.xlu0 %2791, %v472_v61  }
 0x180   : > { %2532 = vmatprep.mubr.msk.bf16.mxu0 %vm643_vm2, %v635_v62 }
 0x181   : > { %v837_v3 = vpop.trf.xlu1 }
 0x183   : > { %v636_v63 = vpop.trf.xlu0 }
 0x184   : > { %2533 = vmatmul.mubr.msk.bf16.vlgmr.msra.gmra.mrb[4].mxu0 %vm643_vm2, %v636_v63 }
 0x185   : > { %2553 = vmatpush3.bf16.msra.mxu0 %v860_v0  ;;  %v838_v5 = vpop.trf.xlu1 }
 0x186   : > { %2708 = vmatprep.subr.msk.bf16.mxu0 %vm656_vm1, %v1047_v1 }
 0x187   : > { %v637_v2 = vpop.trf.xlu0 }
 0x188   : > { %2536 = vmatprep.mubr.msk.bf16.mxu0 %vm643_vm2, %v637_v2 }
 0x189   : > { %v839_v6 = vpop.trf.xlu1 }
 0x18b   : > { %v638_v4 = vpop.trf.xlu0 }
 0x18c   : > { %2537 = vmatmul.mubr.msk.bf16.gmra.mrb[8].mxu0 %vm643_vm2, %v638_v4 }
 0x18d   : > { %2554 = vmatprep.mubr.msk.bf16.mxu0 %vm643_vm2, %v837_v3  ;;  %v840_v9 = vpop.trf.xlu1 }
 0x194   : > { %2555 = vmatmul.mubr.msk.bf16.vlgmr.msra.gmra.mrb[12].mxu0 %vm643_vm2, %v838_v5 }
 0x195   : > { %2575 = vmatpush3.bf16.msra.mxu0 %v1061_v7  ;;  %2558 = vmatprep.mubr.msk.bf16.mxu0 %vm643_vm2, %v839_v6 }
 0x196   : > { %2709 = vmatprep.subr.msk.bf16.mxu0 %vm656_vm1, %v1247_v8 }
 0x19c   : > { %2559 = vmatmul.mubr.msk.bf16.gmra.mrb[16].mxu0 %vm643_vm2, %v840_v9 }
 0x1aa   : > { %v376_v10 = vpop.permute.xlu1 %375 }
 0x1ab   : > { %v453_v12 = vadd.f32 %v3223_v32, %v376_v10 }
 0x1ad   : > { %v371_v11 = vpop.permute.xlu0 %370 }
 0x1ae   : > { %v450_v13 = vadd.f32 %v3221_v27, %v371_v11 }
 0x1b0   : > { %v457_v14 = vpack.c.bf16 %v453_v12, %v450_v13 }
 0x1b2   : > { %v1039_v15 = vpop.trf.xlu0  ;;  %v1458_v24 = vsel %vm656_vm1, %v457_v14, 0  ;;  %v1645_v25 = vrot.slane %v457_v14, 2  ;;  %v1846_v33 = vrot.slane %v457_v14, 4  ;;  %v2046_v40 = vrot.slane %v457_v14, 6 }
 0x1b3   : > { %2576 = vmatprep.mubr.msk.bf16.mxu0 %vm643_vm2, %v1039_v15 }
 0x1b4   : > { %v1239_v16 = vpop.trf.xlu1  ;;  %v1659_v32 = vsel %vm656_vm1, %v1645_v25, 0  ;;  %v1860_v39 = vsel %vm656_vm1, %v1846_v33, 0  ;;  %v2060_v47 = vsel %vm656_vm1, %v2046_v40, 0 }
 0x1b6   : > { %v1040_v17 = vpop.trf.xlu0 }
 0x1b7   : > { %2577 = vmatmul.mubr.msk.bf16.vlgmr.msra.gmra.mrb[20].mxu0 %vm643_vm2, %v1040_v17 }
 0x1b8   : > { %2597 = vmatpush3.bf16.msra.mxu0 %v1261_v18  ;;  %v1240_v19 = vpop.trf.xlu1 }
 0x1b9   : > { %2710 = vmatprep.subr.msk.bf16.mxu0 %vm656_vm1, %v457_v14 }
 0x1ba   : > { %v1041_v20 = vpop.trf.xlu0 }
 0x1bb   : > { %2580 = vmatprep.mubr.msk.bf16.mxu0 %vm643_vm2, %v1041_v20 }
 0x1bc   : > { %v1241_v21 = vpop.trf.xlu1 }
 0x1be   : > { %v1042_v22 = vpop.trf.xlu0 }
 0x1bf   : > { %2581 = vmatmul.mubr.msk.bf16.gmra.mrb[24].mxu0 %vm643_vm2, %v1042_v22 }
 0x1c0   : > { %2598 = vmatprep.mubr.msk.bf16.mxu0 %vm643_vm2, %v1239_v16  ;;  %v1242_v23 = vpop.trf.xlu1 }
 0x1c2   : > { %v1437_v27 = vpop.trf.xlu0 }
 0x1c4   : > { %v1636_v26 = vpop.trf.xlu1 }
 0x1c6   : > { %v1438_v29 = vpop.trf.xlu0 }
 0x1c7   : > { %2599 = vmatmul.mubr.msk.bf16.vlgmr.msra.gmra.mrb[28].mxu0 %vm643_vm2, %v1240_v19 }
 0x1c8   : > { %2619 = vmatpush3.bf16.msra.mxu0 %v1458_v24  ;;  %2602 = vmatprep.mubr.msk.bf16.mxu0 %vm643_vm2, %v1241_v21  ;;  %v1637_v28 = vpop.trf.xlu1 }
 0x1c9   : > { %2711 = vmatprep.subr.msk.bf16.mxu0 %vm656_vm1, %v1645_v25 }
 0x1ca   : > { %v1439_v31 = vpop.trf.xlu0 }
 0x1cc   : > { %v1638_v30 = vpop.trf.xlu1 }
 0x1ce   : > { %v1440_v35 = vpop.trf.xlu0 }
 0x1cf   : > { %2603 = vmatmul.mubr.msk.bf16.gmra.mrb[32].mxu0 %vm643_vm2, %v1242_v23 }
 0x1d0   : > { %2620 = vmatprep.mubr.msk.bf16.mxu0 %vm643_vm2, %v1437_v27  ;;  %v1639_v34 = vpop.trf.xlu1 }
 0x1d2   : > { %v1838_v37 = vpop.trf.xlu0 }
 0x1d4   : > { %v2038_v36 = vpop.trf.xlu1 }
 0x1d6   : > { %v1839_v41 = vpop.trf.xlu0 }
 0x1d7   : > { %2621 = vmatmul.mubr.msk.bf16.vlgmr.msra.gmra.mrb[36].mxu0 %vm643_vm2, %v1438_v29 }
 0x1d8   : > { %2641 = vmatpush3.bf16.msra.mxu0 %v1659_v32  ;;  %2624 = vmatprep.mubr.msk.bf16.mxu0 %vm643_vm2, %v1439_v31  ;;  %v2039_v38 = vpop.trf.xlu1 }
 0x1d9   : > { %2712 = vmatprep.subr.msk.bf16.mxu0 %vm656_vm1, %v1846_v33 }
 0x1da   : > { %v1840_v43 = vpop.trf.xlu0 }
 0x1dc   : > { %v2040_v42 = vpop.trf.xlu1 }
 0x1de   : > { %v1841_v45 = vpop.trf.xlu0 }
 0x1df   : > { %2625 = vmatmul.mubr.msk.bf16.gmra.mrb[40].mxu0 %vm643_vm2, %v1440_v35 }
 0x1e0   : > { %2642 = vmatprep.mubr.msk.bf16.mxu0 %vm643_vm2, %v1636_v26  ;;  %v2041_v44 = vpop.trf.xlu1 }
 0x1e7   : > { %2643 = vmatmul.mubr.msk.bf16.vlgmr.msra.gmra.mrb[44].mxu0 %vm643_vm2, %v1637_v28 }
 0x1e8   : > { %2663 = vmatpush3.bf16.msra.mxu0 %v1860_v39  ;;  %2646 = vmatprep.mubr.msk.bf16.mxu0 %vm643_vm2, %v1638_v30 }
 0x1e9   : > { %2713 = vmatprep.subr.msk.bf16.mxu0 %vm656_vm1, %v2046_v40 }
 0x1ef   : > { %2647 = vmatmul.mubr.msk.bf16.gmra.mrb[48].mxu0 %vm643_vm2, %v1639_v34 }
 0x1f0   : > { %2664 = vmatprep.mubr.msk.bf16.mxu0 %vm643_vm2, %v1838_v37 }
 0x1f7   : > { %v502_v46 = vpop.permute.xlu1 %501  ;;  %2665 = vmatmul.mubr.msk.bf16.vlgmr.msra.gmra.mrb[52].mxu0 %vm643_vm2, %v1839_v41 }
 0x1f8   : > { %2685 = vmatpush3.bf16.msra.mxu0 %v2060_v47  ;;  %2668 = vmatprep.mubr.msk.bf16.mxu0 %vm643_vm2, %v1840_v43  ;;  %v612_v49 = vadd.f32 %v3245_v57, %v502_v46  ;;  %v3044_v57 = vmov 0.0  }
 0x1f9   : > { %2540 = vmatprep.subr.bf16.mxu1 %v3044_v57  ;;  %2548 = vmatprep.mubr.msk.bf16.mxu1 %vm3045_vm3, %v3044_v57 }
 0x1fa   : > { %v497_v48 = vpop.permute.xlu0 %496 }
 0x1fb   : > { %v609_v50 = vadd.f32 %v3241_v55, %v497_v48  ;;  %v512_v51 = vpop.permute.xlu1 %511 }
 0x1fc   : > { %v620_v58 = vadd.f32 %v3243_v56, %v512_v51 }
 0x1fd   : > { %v3305_v52 = vpack.c.bf16 %v612_v49, %v609_v50 }
 0x1fe   : > { %v507_v53 = vpop.permute.xlu0 %506 }
 0x1ff   : > { %v617_v59 = vadd.f32 %v3239_v54, %v507_v53  ;;  %2669 = vmatmul.mubr.msk.bf16.gmra.mrb[56].mxu0 %vm643_vm2, %v1841_v45 }
 0x200   : > { %2686 = vmatprep.mubr.msk.bf16.mxu0 %vm643_vm2, %v2038_v36 }
 0x201   : > { %v3311_v60 = vpack.c.bf16 %v620_v58, %v617_v59 }
 0x207   : > { %2687 = vmatmul.mubr.msk.bf16.vlgmr.msra.gmra.mrb[60].mxu0 %vm643_vm2, %v2039_v38 }
 0x208   : > { %2690 = vmatprep.mubr.msk.bf16.mxu0 %vm643_vm2, %v2040_v42 }
 0x20f   : > { %2691 = vmatmul.mubr.msk.bf16.gmra.mrb[64].mxu0 %vm643_vm2, %v2041_v44 }
 0x257   : > { %v2534_v54 = vpop.f32.mrb[4].mxu0 }
 0x258   : > { %v694_v55 = vpop.f32.mrb[5].mxu0 }
 0x259   : > { %v2535_v56 = vpop.f32.mrb[6].mxu0 }
 0x25a   : > { %v697_v61 = vpop.f32.mrb[7].mxu0 }
 0x25f   : > { %v2538_v62 = vpop.f32.mrb[8].mxu0 }
 0x260   : > { %v727_v63 = vmax.f32 %v2534_v54, %v2538_v62  ;;  %v710_v0 = vpop.f32.mrb[9].mxu0 }
 0x261   : > { %v725_v1 = vmax.f32 %v694_v55, %v710_v0  ;;  %v2539_v2 = vpop.f32.mrb[10].mxu0 }
 0x262   : > { %v728_v3 = vmax.f32 %v2535_v56, %v2539_v2  ;;  %v713_v4 = vpop.f32.mrb[11].mxu0 }
 0x263   : > { %v726_v5 = vmax.f32 %v697_v61, %v713_v4 }
 0x264   : > { %v730_v6 = vmax.f32 %v727_v63, %v728_v3 }
 0x265   : > { %v729_v7 = vmax.f32 %v725_v1, %v726_v5 }
 0x267   : > { %v731_v8 = vmax.f32 %v729_v7, %v730_v6  ;;  %v3319_v9 = vpop.f32.mrb[12].mxu0 }
 0x268   : > { %v3321_v10 = vpop.f32.mrb[13].mxu0 }
 0x269   : > { %v732_v11 = vrot.slane %v731_v8, 4  ;;  %v3323_v12 = vpop.f32.mrb[14].mxu0 }
 0x26a   : > { %v3325_v13 = vpop.f32.mrb[15].mxu0 }
 0x26b   : > { %v733_v14 = vmax.f32 %v731_v8, %v732_v11 }
 0x26d   : > { %v734_v15 = vrot.slane %v733_v14, 2 }
 0x26f   : > { %v735_v16 = vmax.f32 %v733_v14, %v734_v15  ;;  %v3327_v17 = vpop.f32.mrb[16].mxu0 }
 0x270   : > { %v929_v18 = vmax.f32 %v3319_v9, %v3327_v17  ;;  %v3331_v19 = vpop.f32.mrb[17].mxu0 }
 0x271   : > { %v736_v20 = vrot.slane %v735_v16, 1  ;;  %v927_v21 = vmax.f32 %v3321_v10, %v3331_v19  ;;  %v3335_v22 = vpop.f32.mrb[18].mxu0 }
 0x272   : > { %v930_v23 = vmax.f32 %v3323_v12, %v3335_v22  ;;  %v3339_v24 = vpop.f32.mrb[19].mxu0 }
 0x273   : > { %v737_v25 = vmax.f32 %v735_v16, %v736_v20  ;;  %v928_v26 = vmax.f32 %v3325_v13, %v3339_v24 }
 0x274   : > { %v932_v27 = vmax.f32 %v929_v18, %v930_v23 }
 0x275   : > { %v738_v28 = vsub.f32 %v694_v55, %v737_v25  ;;  %v739_v29 = vsub.f32 %v697_v61, %v737_v25  ;;  %v740_v30 = vsub.f32 %v2534_v54, %v737_v25  ;;  %v741_v31 = vsub.f32 %v2535_v56, %v737_v25 }
 0x276   : > { %v742_v32 = vsub.f32 %v710_v0, %v737_v25  ;;  %v743_v33 = vsub.f32 %v713_v4, %v737_v25  ;;  %v744_v34 = vsub.f32 %v2538_v62, %v737_v25  ;;  %v745_v35 = vsub.f32 %v2539_v2, %v737_v25 }
 0x277   : > { %v746_v36 = vmul.f32 1.442695, %v738_v28  ;;  %v748_v37 = vmul.f32 1.442695, %v739_v29  ;;  %v750_v38 = vmul.f32 1.442695, %v740_v30  ;;  %v931_v39 = vmax.f32 %v927_v21, %v928_v26 }
 0x278   : > { %v752_v40 = vmul.f32 1.442695, %v741_v31  ;;  %v754_v41 = vmul.f32 1.442695, %v742_v32  ;;  %v756_v43 = vmul.f32 1.442695, %v743_v33 }
 0x279   : > { %2803 = vpow2.f32 %v746_v36  ;;  %v933_v42 = vmax.f32 %v931_v39, %v932_v27  ;;  %v758_v44 = vmul.f32 1.442695, %v744_v34  ;;  %v760_v46 = vmul.f32 1.442695, %v745_v35 }
 0x27a   : > { %2805 = vpow2.f32 %v748_v37 }
 0x27b   : > { %2807 = vpow2.f32 %v750_v38  ;;  %v934_v45 = vrot.slane %v933_v42, 4 }
 0x27c   : > { %2809 = vpow2.f32 %v752_v40 }
 0x27d   : > { %2811 = vpow2.f32 %v754_v41  ;;  %v935_v47 = vmax.f32 %v933_v42, %v934_v45 }
 0x27e   : > { %2813 = vpow2.f32 %v756_v43 }
 0x27f   : > { %2815 = vpow2.f32 %v758_v44  ;;  %v936_v48 = vrot.slane %v935_v47, 2 }
 0x280   : > { %2817 = vpow2.f32 %v760_v46 }
 0x281   : > { %v937_v49 = vmax.f32 %v935_v47, %v936_v48 }
 0x283   : > { %v2804_v50 = vpop.eup %2803  ;;  %v938_v51 = vrot.slane %v937_v49, 1 }
 0x284   : > { %v2806_v53 = vpop.eup %2805 }
 0x285   : > { %v2808_v58 = vpop.eup %2807  ;;  %v762_v59 = vadd.f32 %v2806_v53, %v2804_v50  ;;  %v939_v54 = vmax.f32 %v937_v49, %v938_v51  ;;  %v775_v55 = vpack.c.bf16 %v2806_v53, %v2804_v50 }
 0x286   : > { %v2810_v56 = vpop.eup %2809 }
 0x287   : > { %v2812_v61 = vpop.eup %2811  ;;  %v763_v62 = vadd.f32 %v2808_v58, %v762_v59  ;;  %v940_v63 = vsub.f32 %v3321_v10, %v939_v54  ;;  %v941_v0 = vsub.f32 %v3325_v13, %v939_v54  ;;  %v942_v1 = vsub.f32 %v3319_v9, %v939_v54  ;;  %2541 = vmatpush3.bf16.msra.mxu1 %v775_v55 }
 0x288   : > { %v2814_v2 = vpop.eup %2813  ;;  %v943_v3 = vsub.f32 %v3323_v12, %v939_v54  ;;  %v944_v4 = vsub.f32 %v3331_v19, %v939_v54  ;;  %v945_v5 = vsub.f32 %v3339_v24, %v939_v54  ;;  %v946_v6 = vsub.f32 %v3327_v17, %v939_v54  ;;  %2542 = vmatprep.subr.bf16.mxu1 %v3044_v57 }
 0x289   : > { %v2816_v7 = vpop.eup %2815  ;;  %v764_v8 = vadd.f32 %v2810_v56, %v763_v62  ;;  %v947_v10 = vsub.f32 %v3335_v22, %v939_v54  ;;  %v948_v11 = vmul.f32 1.442695, %v940_v63  ;;  %v950_v13 = vmul.f32 1.442695, %v941_v0 }
 0x28a   : > { %v2818_v14 = vpop.eup %2817  ;;  %v952_v9 = vmul.f32 1.442695, %v942_v1  ;;  %v954_v15 = vmul.f32 1.442695, %v943_v3  ;;  %v776_v16 = vpack.c.bf16 %v2810_v56, %v2808_v58  ;;  %v956_v12 = vmul.f32 1.442695, %v944_v4 }
 0x28b   : > { %v765_v18 = vadd.f32 %v2812_v61, %v764_v8  ;;  %2819 = vpow2.f32 %v948_v11  ;;  %v3352_v19 = vpop.f32.mrb[20].mxu0  ;;  %v958_v20 = vmul.f32 1.442695, %v945_v5  ;;  %v777_v21 = vpack.c.bf16 %v2814_v2, %v2812_v61 }
 0x28c   : > { %2821 = vpow2.f32 %v950_v13  ;;  %2543 = vmatpush3.bf16.msra.mxu1 %v776_v16  ;;  %v3354_v17 = vpop.f32.mrb[21].mxu0  ;;  %v778_v23 = vpack.c.bf16 %v2818_v14, %v2816_v7  ;;  %v960_v22 = vmul.f32 1.442695, %v946_v6  ;;  %v962_v26 = vmul.f32 1.442695, %v947_v10 }
 0x28d   : > { %v766_v24 = vadd.f32 %v2814_v2, %v765_v18  ;;  %2823 = vpow2.f32 %v952_v9  ;;  %v3356_v25 = vpop.f32.mrb[22].mxu0  ;;  %2544 = vmatprep.subr.bf16.mxu1 %v3044_v57  ;;  %v982_v16 = vrot.slane %v3305_v52, 2 }
 0x28e   : > { %2825 = vpow2.f32 %v954_v15  ;;  %v3359_v27 = vpop.f32.mrb[23].mxu0 }
 0x28f   : > { %v767_v28 = vadd.f32 %v2816_v7, %v766_v24  ;;  %2827 = vpow2.f32 %v956_v12 }
 0x290   : > { %2829 = vpow2.f32 %v958_v20  ;;  %2545 = vmatpush3.bf16.msra.mxu1 %v777_v21 }
 0x291   : > { %v3361_v29 = vadd.f32 %v2818_v14, %v767_v28  ;;  %2831 = vpow2.f32 %v960_v22  ;;  %2546 = vmatprep.subr.bf16.mxu1 %v3044_v57 }
 0x292   : > { %2833 = vpow2.f32 %v962_v26  ;;  %v3364_v30 = vpop.f32.mrb[24].mxu0 }
 0x293   : > { %v1130_v31 = vmax.f32 %v3352_v19, %v3364_v30  ;;  %v3368_v32 = vpop.f32.mrb[25].mxu0 }
 0x294   : > { %2547 = vmatpush3.bf16.msra.mxu1 %v778_v23  ;;  %v1128_v33 = vmax.f32 %v3354_v17, %v3368_v32  ;;  %v3372_v34 = vpop.f32.mrb[26].mxu0 }
 0x295   : > { %v2820_v35 = vpop.eup %2819  ;;  %v1131_v36 = vmax.f32 %v3356_v25, %v3372_v34  ;;  %2562 = vmatprep.subr.bf16.mxu1 %v3044_v57  ;;  %v3377_v37 = vpop.f32.mrb[27].mxu0 }
 0x296   : > { %v2822_v38 = vpop.eup %2821  ;;  %v1129_v39 = vmax.f32 %v3359_v27, %v3377_v37 }
 0x297   : > { %v2824_v40 = vpop.eup %2823  ;;  %v964_v41 = vadd.f32 %v2822_v38, %v2820_v35  ;;  %v1133_v42 = vmax.f32 %v1130_v31, %v1131_v36  ;;  %2549 = vmatmul.mubr.msk.bf16.vlgmr.msra.gmra.mrb[8].mxu1 %vm779_vm4, %v3305_v52  ;;  %v977_v43 = vpack.c.bf16 %v2822_v38, %v2820_v35 }
 0x298   : > { %v2826_v44 = vpop.eup %2825  ;;  %v1132_v45 = vmax.f32 %v1128_v33, %v1129_v39  ;;  %2570 = vmatprep.mubr.msk.bf16.mxu1 %vm3045_vm3, %v3044_v57 }
 0x299   : > { %v2828_v46 = vpop.eup %2827  ;;  %v965_v47 = vadd.f32 %v2824_v40, %v964_v41  ;;  %2563 = vmatpush3.bf16.msra.mxu1 %v977_v43  ;;  %v978_v48 = vpack.c.bf16 %v2826_v44, %v2824_v40 }
 0x29a   : > { %v2830_v49 = vpop.eup %2829  ;;  %v1134_v50 = vmax.f32 %v1132_v45, %v1133_v42  ;;  %2564 = vmatprep.subr.bf16.mxu1 %v3044_v57  ;;  %v3386_v51 = vpop.f32.mrb[28].mxu0 }
 0x29b   : > { %v2832_v53 = vpop.eup %2831  ;;  %v966_v58 = vadd.f32 %v2826_v44, %v965_v47  ;;  %v3388_v59 = vpop.f32.mrb[29].mxu0  ;;  %v979_v54 = vpack.c.bf16 %v2830_v49, %v2828_v46 }
 0x29c   : > { %v2834_v55 = vpop.eup %2833  ;;  %v1135_v56 = vrot.slane %v1134_v50, 4  ;;  %v3390_v61 = vpop.f32.mrb[30].mxu0 }
 0x29d   : > { %v967_v62 = vadd.f32 %v2828_v46, %v966_v58  ;;  %2565 = vmatpush3.bf16.msra.mxu1 %v978_v48  ;;  %v3392_v63 = vpop.f32.mrb[31].mxu0  ;;  %v980_v0 = vpack.c.bf16 %v2834_v55, %v2832_v53 }
 0x29e   : > { %v1136_v1 = vmax.f32 %v1134_v50, %v1135_v56  ;;  %2566 = vmatprep.subr.bf16.mxu1 %v3044_v57 }
 0x29f   : > { %v968_v2 = vadd.f32 %v2830_v49, %v967_v62 }
 0x2a0   : > { %v1137_v3 = vrot.slane %v1136_v1, 2 }
 0x2a1   : > { %v969_v4 = vadd.f32 %v2832_v53, %v968_v2  ;;  %2567 = vmatpush3.bf16.msra.mxu1 %v979_v54 }
 0x2a2   : > { %v1138_v5 = vmax.f32 %v1136_v1, %v1137_v3  ;;  %2568 = vmatprep.subr.bf16.mxu1 %v3044_v57  ;;  %v3396_v6 = vpop.f32.mrb[32].mxu0 }
 0x2a3   : > { %v3398_v7 = vadd.f32 %v2834_v55, %v969_v4  ;;  %v1330_v8 = vmax.f32 %v3386_v51, %v3396_v6  ;;  %v3402_v10 = vpop.f32.mrb[33].mxu0 }
 0x2a4   : > { %v1139_v11 = vrot.slane %v1138_v5, 1  ;;  %v1328_v13 = vmax.f32 %v3388_v59, %v3402_v10  ;;  %v3406_v14 = vpop.f32.mrb[34].mxu0 }
 0x2a5   : > { %2569 = vmatpush3.bf16.msra.mxu1 %v980_v0  ;;  %v1331_v9 = vmax.f32 %v3390_v61, %v3406_v14  ;;  %v3410_v15 = vpop.f32.mrb[35].mxu0 }
 0x2a6   : > { %v1140_v18 = vmax.f32 %v1138_v5, %v1139_v11  ;;  %v1329_v12 = vmax.f32 %v3392_v63, %v3410_v15  ;;  %2584 = vmatprep.subr.bf16.mxu1 %v3044_v57 }
 0x2a7   : > { %v1333_v20 = vmax.f32 %v1330_v8, %v1331_v9 }
 0x2a8   : > { %v1141_v21 = vsub.f32 %v3354_v17, %v1140_v18  ;;  %v1142_v23 = vsub.f32 %v3359_v27, %v1140_v18  ;;  %v1143_v24 = vsub.f32 %v3352_v19, %v1140_v18  ;;  %v1144_v22 = vsub.f32 %v3356_v25, %v1140_v18  ;;  %2571 = vmatmul.mubr.msk.bf16.vlgmr.msra.gmra.mrb[12].mxu1 %vm779_vm4, %v982_v16 }
 0x2a9   : > { %v1145_v26 = vsub.f32 %v3368_v32, %v1140_v18  ;;  %v1146_v28 = vsub.f32 %v3377_v37, %v1140_v18  ;;  %v1147_v31 = vsub.f32 %v3364_v30, %v1140_v18  ;;  %v1148_v33 = vsub.f32 %v3372_v34, %v1140_v18  ;;  %2592 = vmatprep.mubr.msk.bf16.mxu1 %vm3045_vm3, %v3044_v57 }
 0x2aa   : > { %v1149_v17 = vmul.f32 1.442695, %v1141_v21  ;;  %v1151_v35 = vmul.f32 1.442695, %v1142_v23  ;;  %v1153_v27 = vmul.f32 1.442695, %v1143_v24  ;;  %v1332_v36 = vmax.f32 %v1328_v13, %v1329_v12 }
 0x2ab   : > { %v1155_v19 = vmul.f32 1.442695, %v1144_v22  ;;  %v1157_v25 = vmul.f32 1.442695, %v1145_v26  ;;  %v3427_v39 = vpop.f32.mrb[36].mxu0 }
 0x2ac   : > { %2835 = vpow2.f32 %v1149_v17  ;;  %v1334_v38 = vmax.f32 %v1332_v36, %v1333_v20  ;;  %v1159_v32 = vmul.f32 1.442695, %v1146_v28  ;;  %v3429_v37 = vpop.f32.mrb[37].mxu0  ;;  %v1161_v30 = vmul.f32 1.442695, %v1147_v31 }
 0x2ad   : > { %2837 = vpow2.f32 %v1151_v35  ;;  %v3431_v40 = vpop.f32.mrb[38].mxu0  ;;  %v1163_v41 = vmul.f32 1.442695, %v1148_v33 }
 0x2ae   : > { %2839 = vpow2.f32 %v1153_v27  ;;  %v1335_v34 = vrot.slane %v1334_v38, 4  ;;  %v3433_v42 = vpop.f32.mrb[39].mxu0 }
 0x2af   : > { %2841 = vpow2.f32 %v1155_v19 }
 0x2b0   : > { %2843 = vpow2.f32 %v1157_v25  ;;  %v1336_v43 = vmax.f32 %v1334_v38, %v1335_v34 }
 0x2b1   : > { %2845 = vpow2.f32 %v1159_v32 }
 0x2b2   : > { %2847 = vpow2.f32 %v1161_v30  ;;  %v1337_v44 = vrot.slane %v1336_v43, 2  ;;  %v3435_v45 = vpop.f32.mrb[40].mxu0 }
 0x2b3   : > { %2849 = vpow2.f32 %v1163_v41  ;;  %v1527_v46 = vmax.f32 %v3427_v39, %v3435_v45  ;;  %v3439_v47 = vpop.f32.mrb[41].mxu0 }
 0x2b4   : > { %v1338_v48 = vmax.f32 %v1336_v43, %v1337_v44  ;;  %v1525_v49 = vmax.f32 %v3429_v37, %v3439_v47  ;;  %v3443_v50 = vpop.f32.mrb[42].mxu0 }
 0x2b5   : > { %v1528_v53 = vmax.f32 %v3431_v40, %v3443_v50  ;;  %v3447_v58 = vpop.f32.mrb[43].mxu0 }
 0x2b6   : > { %v2836_v54 = vpop.eup %2835  ;;  %v1339_v55 = vrot.slane %v1338_v48, 1  ;;  %v1526_v56 = vmax.f32 %v3433_v42, %v3447_v58 }
 0x2b7   : > { %v2838_v62 = vpop.eup %2837  ;;  %v1530_v0 = vmax.f32 %v1527_v46, %v1528_v53 }
 0x2b8   : > { %v2840_v1 = vpop.eup %2839  ;;  %v1165_v2 = vadd.f32 %v2838_v62, %v2836_v54  ;;  %v1340_v3 = vmax.f32 %v1338_v48, %v1339_v55  ;;  %v1529_v4 = vmax.f32 %v1525_v49, %v1526_v56  ;;  %v1178_v5 = vpack.c.bf16 %v2838_v62, %v2836_v54 }
 0x2b9   : > { %v2842_v8 = vpop.eup %2841 }
 0x2ba   : > { %v2844_v11 = vpop.eup %2843  ;;  %v1166_v13 = vadd.f32 %v2840_v1, %v1165_v2  ;;  %v1341_v9 = vsub.f32 %v3388_v59, %v1340_v3  ;;  %v1342_v16 = vsub.f32 %v3392_v63, %v1340_v3  ;;  %v1343_v18 = vsub.f32 %v3386_v51, %v1340_v3  ;;  %2585 = vmatpush3.bf16.msra.mxu1 %v1178_v5  ;;  %v3454_v12 = vpop.f32.mrb[44].mxu0 }
 0x2bb   : > { %v2846_v20 = vpop.eup %2845  ;;  %v1344_v21 = vsub.f32 %v3390_v61, %v1340_v3  ;;  %v1345_v23 = vsub.f32 %v3402_v10, %v1340_v3  ;;  %v1346_v24 = vsub.f32 %v3410_v15, %v1340_v3  ;;  %v1347_v22 = vsub.f32 %v3396_v6, %v1340_v3  ;;  %v3460_v26 = vpop.f32.mrb[45].mxu0  ;;  %2586 = vmatprep.subr.bf16.mxu1 %v3044_v57 }
 0x2bc   : > { %v2848_v59 = vpop.eup %2847  ;;  %v1167_v63 = vadd.f32 %v2842_v8, %v1166_v13  ;;  %v1348_v51 = vsub.f32 %v3406_v14, %v1340_v3  ;;  %v1349_v28 = vmul.f32 1.442695, %v1341_v9  ;;  %v1351_v31 = vmul.f32 1.442695, %v1342_v16  ;;  %v3464_v33 = vpop.f32.mrb[46].mxu0 }
 0x2bd   : > { %v2850_v17 = vpop.eup %2849  ;;  %v1353_v61 = vmul.f32 1.442695, %v1343_v18  ;;  %v1355_v35 = vmul.f32 1.442695, %v1344_v21  ;;  %v1531_v10 = vmax.f32 %v1529_v4, %v1530_v0  ;;  %v1357_v15 = vmul.f32 1.442695, %v1345_v23 }
 0x2be   : > { %v1168_v27 = vadd.f32 %v2844_v11, %v1167_v63  ;;  %2851 = vpow2.f32 %v1349_v28  ;;  %v1359_v6 = vmul.f32 1.442695, %v1346_v24  ;;  %v3466_v36 = vpop.f32.mrb[47].mxu0  ;;  %v1361_v19 = vmul.f32 1.442695, %v1347_v22 }
 0x2bf   : > { %2853 = vpow2.f32 %v1351_v31  ;;  %v1532_v25 = vrot.slane %v1531_v10, 4  ;;  %v1179_v38 = vpack.c.bf16 %v2842_v8, %v2840_v1  ;;  %v1180_v14 = vpack.c.bf16 %v2846_v20, %v2844_v11 }
 0x2c0   : > { %v1169_v32 = vadd.f32 %v2846_v20, %v1168_v27  ;;  %2855 = vpow2.f32 %v1353_v61  ;;  %v1181_v30 = vpack.c.bf16 %v2850_v17, %v2848_v59  ;;  %v1363_v34 = vmul.f32 1.442695, %v1348_v51 }
 0x2c1   : > { %2857 = vpow2.f32 %v1355_v35  ;;  %v1533_v41 = vmax.f32 %v1531_v10, %v1532_v25  ;;  %2587 = vmatpush3.bf16.msra.mxu1 %v1179_v38  ;;  %v1182_v9 = vrot.slane %v3305_v52, 4 }
 0x2c2   : > { %v1170_v43 = vadd.f32 %v2848_v59, %v1169_v32  ;;  %2859 = vpow2.f32 %v1357_v15  ;;  %2588 = vmatprep.subr.bf16.mxu1 %v3044_v57  ;;  %v3469_v44 = vpop.f32.mrb[48].mxu0 }
 0x2c3   : > { %2861 = vpow2.f32 %v1359_v6  ;;  %v1534_v46 = vrot.slane %v1533_v41, 2  ;;  %v1728_v48 = vmax.f32 %v3454_v12, %v3469_v44  ;;  %v3473_v49 = vpop.f32.mrb[49].mxu0 }
 0x2c4   : > { %v3475_v53 = vadd.f32 %v2850_v17, %v1170_v43  ;;  %2863 = vpow2.f32 %v1361_v19  ;;  %v1726_v54 = vmax.f32 %v3460_v26, %v3473_v49  ;;  %v3479_v55 = vpop.f32.mrb[50].mxu0 }
 0x2c5   : > { %2865 = vpow2.f32 %v1363_v34  ;;  %v1535_v56 = vmax.f32 %v1533_v41, %v1534_v46  ;;  %2589 = vmatpush3.bf16.msra.mxu1 %v1180_v14  ;;  %v1729_v62 = vmax.f32 %v3464_v33, %v3479_v55  ;;  %v3483_v0 = vpop.f32.mrb[51].mxu0 }
 0x2c6   : > { %2590 = vmatprep.subr.bf16.mxu1 %v3044_v57  ;;  %v1727_v1 = vmax.f32 %v3466_v36, %v3483_v0 }
 0x2c7   : > { %v1536_v2 = vrot.slane %v1535_v56, 1  ;;  %v1731_v3 = vmax.f32 %v1728_v48, %v1729_v62 }
 0x2c8   : > { %v2852_v4 = vpop.eup %2851  ;;  %v1730_v5 = vmax.f32 %v1726_v54, %v1727_v1 }
 0x2c9   : > { %v2854_v8 = vpop.eup %2853  ;;  %v1537_v11 = vmax.f32 %v1535_v56, %v1536_v2  ;;  %2591 = vmatpush3.bf16.msra.mxu1 %v1181_v30 }
 0x2ca   : > { %v2856_v13 = vpop.eup %2855  ;;  %v1365_v16 = vadd.f32 %v2854_v8, %v2852_v4  ;;  %v1732_v18 = vmax.f32 %v1730_v5, %v1731_v3  ;;  %2606 = vmatprep.subr.bf16.mxu1 %v3044_v57  ;;  %v1378_v20 = vpack.c.bf16 %v2854_v8, %v2852_v4  ;;  %v3490_v21 = vpop.f32.mrb[52].mxu0 }
 0x2cb   : > { %v2858_v23 = vpop.eup %2857  ;;  %v1538_v24 = vsub.f32 %v3429_v37, %v1537_v11  ;;  %v1539_v22 = vsub.f32 %v3433_v42, %v1537_v11  ;;  %v1540_v59 = vsub.f32 %v3427_v39, %v1537_v11  ;;  %v1541_v63 = vsub.f32 %v3431_v40, %v1537_v11  ;;  %v3496_v51 = vpop.f32.mrb[53].mxu0 }
 0x2cc   : > { %v2860_v28 = vpop.eup %2859  ;;  %v1366_v31 = vadd.f32 %v2856_v13, %v1365_v16  ;;  %v1542_v17 = vsub.f32 %v3439_v47, %v1537_v11  ;;  %v1543_v61 = vsub.f32 %v3447_v58, %v1537_v11  ;;  %v1544_v35 = vsub.f32 %v3435_v45, %v1537_v11  ;;  %2593 = vmatmul.mubr.msk.bf16.vlgmr.msra.gmra.mrb[16].mxu1 %vm779_vm4, %v1182_v9  ;;  %v3502_v10 = vpop.f32.mrb[54].mxu0 }
 0x2cd   : > { %v2862_v37 = vpop.eup %2861  ;;  %v1545_v42 = vsub.f32 %v3443_v50, %v1537_v11  ;;  %v1546_v39 = vmul.f32 1.442695, %v1538_v24  ;;  %v1548_v27 = vmul.f32 1.442695, %v1539_v22  ;;  %v1550_v40 = vmul.f32 1.442695, %v1540_v59  ;;  %2607 = vmatpush3.bf16.msra.mxu1 %v1378_v20  ;;  %2614 = vmatprep.mubr.msk.bf16.mxu1 %vm3045_vm3, %v3044_v57 }
 0x2ce   : > { %v2864_v15 = vpop.eup %2863  ;;  %v1367_v47 = vadd.f32 %v2858_v23, %v1366_v31  ;;  %v1552_v6 = vmul.f32 1.442695, %v1541_v63  ;;  %2608 = vmatprep.subr.bf16.mxu1 %v3044_v57  ;;  %v1554_v58 = vmul.f32 1.442695, %v1542_v17  ;;  %v1556_v19 = vmul.f32 1.442695, %v1543_v61 }
 0x2cf   : > { %v2866_v45 = vpop.eup %2865  ;;  %2867 = vpow2.f32 %v1546_v39  ;;  %v1733_v25 = vrot.slane %v1732_v18, 4  ;;  %v3508_v38 = vpop.f32.mrb[55].mxu0  ;;  %v1379_v32 = vpack.c.bf16 %v2858_v23, %v2856_v13  ;;  %v1380_v14 = vpack.c.bf16 %v2862_v37, %v2860_v28 }
 0x2d0   : > { %v1368_v50 = vadd.f32 %v2860_v28, %v1367_v47  ;;  %2869 = vpow2.f32 %v1548_v27  ;;  %v1558_v30 = vmul.f32 1.442695, %v1544_v35  ;;  %v1381_v41 = vpack.c.bf16 %v2866_v45, %v2864_v15 }
 0x2d1   : > { %2871 = vpow2.f32 %v1550_v40  ;;  %v1734_v34 = vmax.f32 %v1732_v18, %v1733_v25  ;;  %v1560_v46 = vmul.f32 1.442695, %v1545_v42  ;;  %2609 = vmatpush3.bf16.msra.mxu1 %v1379_v32  ;;  %v1382_v22 = vrot.slane %v3305_v52, 6 }
 0x2d2   : > { %v1369_v43 = vadd.f32 %v2862_v37, %v1368_v50  ;;  %2873 = vpow2.f32 %v1552_v6  ;;  %v3510_v48 = vpop.f32.mrb[56].mxu0  ;;  %2610 = vmatprep.subr.bf16.mxu1 %v3044_v57 }
 0x2d3   : > { %2875 = vpow2.f32 %v1554_v58  ;;  %v1735_v54 = vrot.slane %v1734_v34, 2  ;;  %v1929_v56 = vmax.f32 %v3490_v21, %v3510_v48  ;;  %v3515_v62 = vpop.f32.mrb[57].mxu0 }
 0x2d4   : > { %v1370_v1 = vadd.f32 %v2864_v15, %v1369_v43  ;;  %2877 = vpow2.f32 %v1556_v19  ;;  %v1927_v2 = vmax.f32 %v3496_v51, %v3515_v62  ;;  %v3519_v3 = vpop.f32.mrb[58].mxu0 }
 0x2d5   : > { %2879 = vpow2.f32 %v1558_v30  ;;  %v1736_v4 = vmax.f32 %v1734_v34, %v1735_v54  ;;  %v1930_v5 = vmax.f32 %v3502_v10, %v3519_v3  ;;  %v3523_v8 = vpop.f32.mrb[59].mxu0  ;;  %2611 = vmatpush3.bf16.msra.mxu1 %v1380_v14 }
 0x2d6   : > { %v3525_v11 = vadd.f32 %v2866_v45, %v1370_v1  ;;  %2881 = vpow2.f32 %v1560_v46  ;;  %v1928_v13 = vmax.f32 %v3508_v38, %v3523_v8  ;;  %2612 = vmatprep.subr.bf16.mxu1 %v3044_v57 }
 0x2d7   : > { %v1737_v9 = vrot.slane %v1736_v4, 1  ;;  %v1932_v16 = vmax.f32 %v1929_v56, %v1930_v5 }
 0x2d8   : > { %v1931_v18 = vmax.f32 %v1927_v2, %v1928_v13 }
 0x2d9   : > { %v2868_v20 = vpop.eup %2867  ;;  %v1738_v23 = vmax.f32 %v1736_v4, %v1737_v9  ;;  %2613 = vmatpush3.bf16.msra.mxu1 %v1381_v41 }
 0x2da   : > { %v2870_v24 = vpop.eup %2869  ;;  %v1933_v59 = vmax.f32 %v1931_v18, %v1932_v16  ;;  %v3531_v63 = vpop.f32.mrb[60].mxu0  ;;  %2628 = vmatprep.subr.bf16.mxu1 %v3044_v57 }
 0x2db   : > { %v2872_v28 = vpop.eup %2871  ;;  %v1562_v31 = vadd.f32 %v2870_v24, %v2868_v20  ;;  %v1739_v17 = vsub.f32 %v3460_v26, %v1738_v23  ;;  %v1740_v61 = vsub.f32 %v3466_v36, %v1738_v23  ;;  %v1741_v35 = vsub.f32 %v3454_v12, %v1738_v23  ;;  %v3537_v37 = vpop.f32.mrb[61].mxu0 }
 0x2dc   : > { %v2874_v42 = vpop.eup %2873  ;;  %v1742_v39 = vsub.f32 %v3464_v33, %v1738_v23  ;;  %v1743_v52 = vsub.f32 %v3473_v49, %v1738_v23  ;;  %v1744_v27 = vsub.f32 %v3483_v0, %v1738_v23  ;;  %v1745_v40 = vsub.f32 %v3469_v44, %v1738_v23  ;;  %v3543_v15 = vpop.f32.mrb[62].mxu0  ;;  %2615 = vmatmul.mubr.msk.bf16.vlgmr.msra.gmra.mrb[20].mxu1 %vm779_vm4, %v1382_v22 }
 0x2dd   : > { %v2876_v26 = vpop.eup %2875  ;;  %v1563_v47 = vadd.f32 %v2872_v28, %v1562_v31  ;;  %v1746_v36 = vsub.f32 %v3479_v55, %v1738_v23  ;;  %v1747_v12 = vmul.f32 1.442695, %v1739_v17  ;;  %v1749_v6 = vmul.f32 1.442695, %v1740_v61  ;;  %v3547_v45 = vpop.f32.mrb[63].mxu0  ;;  %2636 = vmatprep.mubr.msk.bf16.mxu1 %vm3045_vm3, %v3044_v57 }
 0x2de   : > { %v2878_v58 = vpop.eup %2877  ;;  %v1751_v33 = vmul.f32 1.442695, %v1741_v35  ;;  %v1753_v19 = vmul.f32 1.442695, %v1742_v39  ;;  %v1575_v49 = vpack.c.bf16 %v2870_v24, %v2868_v20  ;;  %v1755_v25 = vmul.f32 1.442695, %v1743_v52 }
 0x2df   : > { %v2880_v44 = vpop.eup %2879  ;;  %v1564_v0 = vadd.f32 %v2874_v42, %v1563_v47  ;;  %2883 = vpow2.f32 %v1747_v12  ;;  %v1757_v50 = vmul.f32 1.442695, %v1744_v27  ;;  %v1759_v55 = vmul.f32 1.442695, %v1745_v40 }
 0x2e0   : > { %v2882_v32 = vpop.eup %2881  ;;  %2885 = vpow2.f32 %v1749_v6  ;;  %v1934_v14 = vrot.slane %v1933_v59, 4  ;;  %2629 = vmatpush3.bf16.msra.mxu1 %v1575_v49  ;;  %v1576_v30 = vpack.c.bf16 %v2874_v42, %v2872_v28  ;;  %v1577_v41 = vpack.c.bf16 %v2878_v58, %v2876_v26 }
 0x2e1   : > { %v1565_v34 = vadd.f32 %v2876_v26, %v1564_v0  ;;  %2887 = vpow2.f32 %v1751_v33  ;;  %2630 = vmatprep.subr.bf16.mxu1 %v3044_v57  ;;  %v1578_v43 = vpack.c.bf16 %v2882_v32, %v2880_v44  ;;  %v1761_v46 = vmul.f32 1.442695, %v1746_v36 }
 0x2e2   : > { %2889 = vpow2.f32 %v1753_v19  ;;  %v1935_v54 = vmax.f32 %v1933_v59, %v1934_v14  ;;  %v3552_v56 = vpop.f32.mrb[64].mxu0 }
 0x2e3   : > { %v1566_v1 = vadd.f32 %v2878_v58, %v1565_v34  ;;  %2891 = vpow2.f32 %v1755_v25  ;;  %v2129_v2 = vmax.f32 %v3531_v63, %v3552_v56  ;;  %v3556_v4 = vpop.f32.mrb[65].mxu0 }
 0x2e4   : > { %2893 = vpow2.f32 %v1757_v50  ;;  %v1936_v5 = vrot.slane %v1935_v54, 2  ;;  %2631 = vmatpush3.bf16.msra.mxu1 %v1576_v30  ;;  %v2127_v13 = vmax.f32 %v3537_v37, %v3556_v4  ;;  %v3560_v9 = vpop.f32.mrb[66].mxu0 }
 0x2e5   : > { %v1567_v16 = vadd.f32 %v2880_v44, %v1566_v1  ;;  %2895 = vpow2.f32 %v1759_v55  ;;  %2632 = vmatprep.subr.bf16.mxu1 %v3044_v57  ;;  %v2130_v18 = vmax.f32 %v3543_v15, %v3560_v9  ;;  %v3565_v20 = vpop.f32.mrb[67].mxu0 }
 0x2e6   : > { %2897 = vpow2.f32 %v1761_v46  ;;  %v1937_v23 = vmax.f32 %v1935_v54, %v1936_v5  ;;  %v2128_v24 = vmax.f32 %v3547_v45, %v3565_v20 }
 0x2e7   : > { %v3569_v22 = vadd.f32 %v2882_v32, %v1567_v16  ;;  %v2132_v59 = vmax.f32 %v2129_v2, %v2130_v18 }
 0x2e8   : > { %v1938_v28 = vrot.slane %v1937_v23, 1  ;;  %2633 = vmatpush3.bf16.msra.mxu1 %v1577_v41  ;;  %v2131_v31 = vmax.f32 %v2127_v13, %v2128_v24  ;;  %v1781_v24 = vrot.slane %v3311_v60, 2 }
 0x2e9   : > { %v2884_v17 = vpop.eup %2883  ;;  %2634 = vmatprep.subr.bf16.mxu1 %v3044_v57 }
 0x2ea   : > { %v2886_v61 = vpop.eup %2885  ;;  %v1939_v35 = vmax.f32 %v1937_v23, %v1938_v28  ;;  %v2133_v42 = vmax.f32 %v2131_v31, %v2132_v59 }
 0x2eb   : > { %v2888_v39 = vpop.eup %2887  ;;  %v1763_v52 = vadd.f32 %v2886_v61, %v2884_v17  ;;  %v1776_v27 = vpack.c.bf16 %v2886_v61, %v2884_v17 }
 0x2ec   : > { %v2890_v40 = vpop.eup %2889  ;;  %v1940_v26 = vsub.f32 %v3496_v51, %v1939_v35  ;;  %v1941_v47 = vsub.f32 %v3508_v38, %v1939_v35  ;;  %v1942_v36 = vsub.f32 %v3490_v21, %v1939_v35  ;;  %v1943_v12 = vsub.f32 %v3502_v10, %v1939_v35  ;;  %2635 = vmatpush3.bf16.msra.mxu1 %v1578_v43 }
 0x2ed   : > { %v2892_v6 = vpop.eup %2891  ;;  %v1764_v58 = vadd.f32 %v2888_v39, %v1763_v52  ;;  %v1944_v33 = vsub.f32 %v3515_v62, %v1939_v35  ;;  %v1945_v19 = vsub.f32 %v3523_v8, %v1939_v35  ;;  %v1946_v49 = vsub.f32 %v3510_v48, %v1939_v35  ;;  %2650 = vmatprep.subr.bf16.mxu1 %v3044_v57 }
 0x2ee   : > { %v2894_v44 = vpop.eup %2893  ;;  %v1947_v51 = vsub.f32 %v3519_v3, %v1939_v35  ;;  %v1948_v0 = vmul.f32 1.442695, %v1940_v26  ;;  %v1950_v38 = vmul.f32 1.442695, %v1941_v47  ;;  %v1952_v25 = vmul.f32 1.442695, %v1942_v36 }
 0x2ef   : > { %v2896_v21 = vpop.eup %2895  ;;  %v1765_v50 = vadd.f32 %v2890_v40, %v1764_v58  ;;  %v1954_v10 = vmul.f32 1.442695, %v1943_v12  ;;  %2637 = vmatmul.mubr.msk.bf16.vlgmr.msra.gmra.mrb[24].mxu1 %vm779_vm4, %v3311_v60  ;;  %v1956_v62 = vmul.f32 1.442695, %v1944_v33  ;;  %v1958_v8 = vmul.f32 1.442695, %v1945_v19 }
 0x2f0   : > { %v2898_v32 = vpop.eup %2897  ;;  %2899 = vpow2.f32 %v1948_v0  ;;  %v2134_v55 = vrot.slane %v2133_v42, 4  ;;  %2651 = vmatpush3.bf16.msra.mxu1 %v1776_v27  ;;  %2658 = vmatprep.mubr.msk.bf16.mxu1 %vm3045_vm3, %v3044_v57  ;;  %v1777_v3 = vpack.c.bf16 %v2890_v40, %v2888_v39  ;;  %v1778_v14 = vpack.c.bf16 %v2894_v44, %v2892_v6 }
 0x2f1   : > { %v1766_v48 = vadd.f32 %v2892_v6, %v1765_v50  ;;  %2901 = vpow2.f32 %v1950_v38  ;;  %2652 = vmatprep.subr.bf16.mxu1 %v3044_v57  ;;  %v1960_v30 = vmul.f32 1.442695, %v1946_v49  ;;  %v1779_v41 = vpack.c.bf16 %v2898_v32, %v2896_v21 }
 0x2f2   : > { %2903 = vpow2.f32 %v1952_v25  ;;  %v2135_v34 = vmax.f32 %v2133_v42, %v2134_v55  ;;  %v1962_v46 = vmul.f32 1.442695, %v1947_v51 }
 0x2f3   : > { %v1767_v43 = vadd.f32 %v2894_v44, %v1766_v48  ;;  %2905 = vpow2.f32 %v1954_v10  ;;  %v1981_v48 = vrot.slane %v3311_v60, 4 }
 0x2f4   : > { %2907 = vpow2.f32 %v1956_v62  ;;  %v2136_v54 = vrot.slane %v2135_v34, 2  ;;  %2653 = vmatpush3.bf16.msra.mxu1 %v1777_v3 }
 0x2f5   : > { %v1768_v1 = vadd.f32 %v2896_v21, %v1767_v43  ;;  %2909 = vpow2.f32 %v1958_v8  ;;  %2654 = vmatprep.subr.bf16.mxu1 %v3044_v57 }
 0x2f6   : > { %2911 = vpow2.f32 %v1960_v30  ;;  %v2137_v2 = vmax.f32 %v2135_v34, %v2136_v54 }
 0x2f7   : > { %v3587_v5 = vadd.f32 %v2898_v32, %v1768_v1  ;;  %2913 = vpow2.f32 %v1962_v46 }
 0x2f8   : > { %v2138_v13 = vrot.slane %v2137_v2, 1  ;;  %2655 = vmatpush3.bf16.msra.mxu1 %v1778_v14 }
 0x2f9   : > { %2656 = vmatprep.subr.bf16.mxu1 %v3044_v57 }
 0x2fa   : > { %v2900_v16 = vpop.eup %2899  ;;  %v2139_v18 = vmax.f32 %v2137_v2, %v2138_v13 }
 0x2fb   : > { %v2902_v23 = vpop.eup %2901 }
 0x2fc   : > { %v2904_v59 = vpop.eup %2903  ;;  %v1964_v28 = vadd.f32 %v2902_v23, %v2900_v16  ;;  %v2140_v31 = vsub.f32 %v3537_v37, %v2139_v18  ;;  %v2141_v17 = vsub.f32 %v3547_v45, %v2139_v18  ;;  %v2142_v61 = vsub.f32 %v3531_v63, %v2139_v18  ;;  %2657 = vmatpush3.bf16.msra.mxu1 %v1779_v41 }
 0x2fd   : > { %v2906_v35 = vpop.eup %2905  ;;  %v2143_v42 = vsub.f32 %v3543_v15, %v2139_v18  ;;  %v2144_v39 = vsub.f32 %v3556_v4, %v2139_v18  ;;  %v2145_v52 = vsub.f32 %v3565_v20, %v2139_v18  ;;  %v2146_v27 = vsub.f32 %v3552_v56, %v2139_v18  ;;  %2672 = vmatprep.subr.bf16.mxu1 %v3044_v57 }
 0x2fe   : > { %v2908_v40 = vpop.eup %2907  ;;  %v1965_v26 = vadd.f32 %v2904_v59, %v1964_v28  ;;  %v2147_v37 = vsub.f32 %v3560_v9, %v2139_v18  ;;  %v2148_v47 = vmul.f32 1.442695, %v2140_v31  ;;  %v2150_v45 = vmul.f32 1.442695, %v2141_v17 }
 0x2ff   : > { %v2910_v36 = vpop.eup %2909  ;;  %v2152_v63 = vmul.f32 1.442695, %v2142_v61  ;;  %v2154_v12 = vmul.f32 1.442695, %v2143_v42  ;;  %2659 = vmatmul.mubr.msk.bf16.vlgmr.msra.gmra.mrb[28].mxu1 %vm779_vm4, %v1781_v24  ;;  %v1977_v15 = vpack.c.bf16 %v2902_v23, %v2900_v16  ;;  %v2156_v20 = vmul.f32 1.442695, %v2144_v39 }
 0x300   : > { %v2912_v6 = vpop.eup %2911  ;;  %v1966_v4 = vadd.f32 %v2906_v35, %v1965_v26  ;;  %2915 = vpow2.f32 %v2148_v47  ;;  %2680 = vmatprep.mubr.msk.bf16.mxu1 %vm3045_vm3, %v3044_v57  ;;  %v2158_v58 = vmul.f32 1.442695, %v2145_v52  ;;  %v1978_v9 = vpack.c.bf16 %v2906_v35, %v2904_v59 }
 0x301   : > { %v2914_v56 = vpop.eup %2913  ;;  %2917 = vpow2.f32 %v2150_v45  ;;  %2673 = vmatpush3.bf16.msra.mxu1 %v1977_v15  ;;  %v1979_v33 = vpack.c.bf16 %v2910_v36, %v2908_v40  ;;  %v2160_v49 = vmul.f32 1.442695, %v2146_v27  ;;  %v2162_v51 = vmul.f32 1.442695, %v2147_v37 }
 0x302   : > { %v1967_v19 = vadd.f32 %v2908_v40, %v1966_v4  ;;  %2919 = vpow2.f32 %v2152_v63  ;;  %2674 = vmatprep.subr.bf16.mxu1 %v3044_v57  ;;  %v1980_v44 = vpack.c.bf16 %v2914_v56, %v2912_v6  ;;  %v2181_v18 = vrot.slane %v3311_v60, 6 }
 0x303   : > { %2921 = vpow2.f32 %v2154_v12  ;;  %v769_v23 = vrot.slane %v3361_v29, 4  ;;  %v971_v17 = vrot.slane %v3398_v7, 4 }
 0x304   : > { %v1968_v0 = vadd.f32 %v2910_v36, %v1967_v19  ;;  %2923 = vpow2.f32 %v2156_v20 }
 0x305   : > { %2925 = vpow2.f32 %v2158_v58  ;;  %2675 = vmatpush3.bf16.msra.mxu1 %v1978_v9  ;;  %v770_v24 = vadd.f32 %v769_v23, %v3361_v29  ;;  %v972_v35 = vadd.f32 %v971_v17, %v3398_v7  ;;  %v1172_v7 = vrot.slane %v3475_v53, 4 }
 0x306   : > { %v1969_v38 = vadd.f32 %v2912_v6, %v1968_v0  ;;  %2927 = vpow2.f32 %v2160_v49  ;;  %2676 = vmatprep.subr.bf16.mxu1 %v3044_v57  ;;  %v1372_v9 = vrot.slane %v3525_v11, 4 }
 0x307   : > { %2929 = vpow2.f32 %v2162_v51  ;;  %v771_v59 = vrot.slane %v770_v24, 2  ;;  %v973_v42 = vrot.slane %v972_v35, 2  ;;  %v1173_v6 = vadd.f32 %v1172_v7, %v3475_v53 }
 0x308   : > { %v3605_v25 = vadd.f32 %v2914_v56, %v1969_v38  ;;  %v1373_v19 = vadd.f32 %v1372_v9, %v3525_v11 }
 0x309   : > { %2677 = vmatpush3.bf16.msra.mxu1 %v1979_v33  ;;  %v772_v28 = vadd.f32 %v771_v59, %v770_v24  ;;  %v1174_v4 = vrot.slane %v1173_v6, 2 }
 0x30a   : > { %v2916_v21 = vpop.eup %2915  ;;  %2678 = vmatprep.subr.bf16.mxu1 %v3044_v57  ;;  %v1374_v49 = vrot.slane %v1373_v19, 2  ;;  %v1971_v23 = vrot.slane %v3605_v25, 4 }
 0x30b   : > { %v2918_v50 = vpop.eup %2917  ;;  %v773_v31 = vrot.slane %v772_v28, 1  ;;  %v1175_v56 = vadd.f32 %v1174_v4, %v1173_v6 }
 0x30c   : > { %v2920_v10 = vpop.eup %2919  ;;  %v2164_v32 = vadd.f32 %v2918_v50, %v2916_v21  ;;  %v2177_v62 = vpack.c.bf16 %v2918_v50, %v2916_v21  ;;  %v1569_v50 = vrot.slane %v3569_v22, 4 }
 0x30d   : > { %v2922_v8 = vpop.eup %2921  ;;  %2679 = vmatpush3.bf16.msra.mxu1 %v1980_v44  ;;  %v774_v61 = vadd.f32 %v773_v31, %v772_v28  ;;  %v1176_v58 = vrot.slane %v1175_v56, 1  ;;  %v1375_v44 = vadd.f32 %v1374_v49, %v1373_v19 }
 0x30e   : > { %v2924_v55 = vpop.eup %2923  ;;  %v2165_v3 = vadd.f32 %v2920_v10, %v2164_v32  ;;  %2694 = vmatprep.subr.bf16.mxu1 %v3044_v57  ;;  %v2178_v14 = vpack.c.bf16 %v2922_v8, %v2920_v10 }
 0x30f   : > { %v2926_v30 = vpop.eup %2925  ;;  %2931 = vrcp.f32 %v774_v61  ;;  %v1177_v33 = vadd.f32 %v1176_v58, %v1175_v56  ;;  %v1376_v51 = vrot.slane %v1375_v44, 1 }
 0x310   : > { %v2928_v34 = vpop.eup %2927  ;;  %v2166_v41 = vadd.f32 %v2922_v8, %v2165_v3  ;;  %2681 = vmatmul.mubr.msk.bf16.vlgmr.msra.gmra.mrb[32].mxu1 %vm779_vm4, %v1981_v48  ;;  %v2179_v43 = vpack.c.bf16 %v2926_v30, %v2924_v55  ;;  %v1570_v8 = vadd.f32 %v1569_v50, %v3569_v22 }
 0x311   : > { %v2930_v46 = vpop.eup %2929  ;;  %2695 = vmatpush3.bf16.msra.mxu1 %v2177_v62  ;;  %2702 = vmatprep.mubr.msk.bf16.mxu1 %vm3045_vm3, %v3044_v57  ;;  %v1377_v62 = vadd.f32 %v1376_v51, %v1375_v44 }
 0x312   : > { %v2167_v54 = vadd.f32 %v2924_v55, %v2166_v41  ;;  %2696 = vmatprep.subr.bf16.mxu1 %v3044_v57  ;;  %v2180_v1 = vpack.c.bf16 %v2930_v46, %v2928_v34  ;;  %v1571_v55 = vrot.slane %v1570_v8, 2 }
 0x314   : > { %v2168_v2 = vadd.f32 %v2926_v30, %v2167_v54  ;;  %v1572_v11 = vadd.f32 %v1571_v55, %v1570_v8  ;;  %v1770_v30 = vrot.slane %v3587_v5, 4 }
 0x315   : > { %2697 = vmatpush3.bf16.msra.mxu1 %v2178_v14 }
 0x316   : > { %v2169_v13 = vadd.f32 %v2928_v34, %v2168_v2  ;;  %2698 = vmatprep.subr.bf16.mxu1 %v3044_v57  ;;  %v1573_v14 = vrot.slane %v1572_v11, 1 }
 0x318   : > { %v3615_v16 = vadd.f32 %v2930_v46, %v2169_v13  ;;  %v1574_v54 = vadd.f32 %v1573_v14, %v1572_v11 }
 0x319   : > { %2699 = vmatpush3.bf16.msra.mxu1 %v2179_v43  ;;  %v2932_v52 = vpop.eup %2931 }
 0x31a   : > { %2700 = vmatprep.subr.bf16.mxu1 %v3044_v57  ;;  %v974_v57 = vadd.f32 %v973_v42, %v972_v35  ;;  %v1972_v42 = vadd.f32 %v1971_v23, %v3605_v25 }
 0x31c   : > { %v975_v39 = vrot.slane %v974_v57, 1 }
 0x31d   : > { %2701 = vmatpush3.bf16.msra.mxu1 %v2180_v1  ;;  %v1771_v1 = vadd.f32 %v1770_v30, %v3587_v5  ;;  %v1973_v5 = vrot.slane %v1972_v42, 2 }
 0x31e   : > { %v976_v37 = vadd.f32 %v975_v39, %v974_v57 }
 0x31f   : > { %v1772_v2 = vrot.slane %v1771_v1, 2  ;;  %v1974_v57 = vadd.f32 %v1973_v5, %v1972_v42 }
 0x320   : > { %2703 = vmatmul.mubr.msk.bf16.vlgmr.msra.gmra.mrb[36].mxu1 %vm779_vm4, %v2181_v18  ;;  %2933 = vrcp.f32 %v976_v37 }
 0x321   : > { %2935 = vrcp.f32 %v1177_v33  ;;  %v1773_v13 = vadd.f32 %v1772_v2, %v1771_v1  ;;  %v1975_v39 = vrot.slane %v1974_v57, 1 }
 0x322   : > { %2937 = vrcp.f32 %v1377_v62 }
 0x323   : > { %2939 = vrcp.f32 %v1574_v54  ;;  %v1774_v18 = vrot.slane %v1773_v13, 1 }
 0x325   : > { %v1775_v61 = vadd.f32 %v1774_v18, %v1773_v13 }
 0x327   : > { %2941 = vrcp.f32 %v1775_v61 }
 0x32a   : > { %v2934_v47 = vpop.eup %2933 }
 0x32b   : > { %v2936_v0 = vpop.eup %2935 }
 0x32c   : > { %v2938_v48 = vpop.eup %2937 }
 0x32d   : > { %v2940_v24 = vpop.eup %2939 }
 0x36a   : > { %v817_v60 = vpop.f32.mrb[8].mxu1 }
 0x36b   : > { %v824_v27 = vmul.f32 %v2932_v52, %v817_v60  ;;  %v2550_v40 = vpop.f32.mrb[9].mxu1  ;;  %v2171_v52 = vrot.slane %v3615_v16, 4  ;;  %v2942_v60 = vpop.eup %2941 }
 0x36c   : > { %v820_v26 = vpop.f32.mrb[10].mxu1 }
 0x36d   : > { %825 = vst [vmem:[#allocation2] sm:$0xf] %v824_v27  ;;  %v2551_v29 = vpop.f32.mrb[11].mxu1 }
 0x37b   : > { %v1020_v45 = vpop.f32.mrb[12].mxu1 }
 0x37c   : > { %v1027_v36 = vmul.f32 %v2934_v47, %v1020_v45  ;;  %v2572_v63 = vpop.f32.mrb[13].mxu1  ;;  %v1976_v47 = vadd.f32 %v1975_v39, %v1974_v57  ;;  %v2172_v45 = vadd.f32 %v2171_v52, %v3615_v16 }
 0x37d   : > { %v1023_v12 = vpop.f32.mrb[14].mxu1 }
 0x37e   : > { %1028 = vst [vmem:[#allocation2 + $0x4] sm:$0xf] %v1027_v36  ;;  %v2573_v15 = vpop.f32.mrb[15].mxu1  ;;  %2943 = vrcp.f32 %v1976_v47  ;;  %v2173_v36 = vrot.slane %v2172_v45, 2 }
 0x380   : > { %v2174_v63 = vadd.f32 %v2173_v36, %v2172_v45 }
 0x382   : > { %v2175_v12 = vrot.slane %v2174_v63, 1 }
 0x384   : > { %v2176_v56 = vadd.f32 %v2175_v12, %v2174_v63 }
 0x385   : > { %v2228_v20 = vld [vmem:[#allocation2] sm:$0xff] }
 0x386   : > { %2232 = vst [vmem:[%s3627_s10] sm:$0xff] %v2228_v20  ;;  %2945 = vrcp.f32 %v2176_v56 }
 0x388   : > { %v2944_v7 = vpop.eup %2943 }
 0x390   : > { %v2946_v16 = vpop.eup %2945 }
 0x39f   : > { %v1220_v38 = vpop.f32.mrb[16].mxu1 }
 0x3a0   : > { %v1227_v53 = vmul.f32 %v2936_v0, %v1220_v38  ;;  %v2594_v21 = vpop.f32.mrb[17].mxu1 }
 0x3a1   : > { %v1223_v10 = vpop.f32.mrb[18].mxu1 }
 0x3a2   : > { %1228 = vst [vmem:[#allocation2 + $0x8] sm:$0xf] %v1227_v53  ;;  %v2595_v32 = vpop.f32.mrb[19].mxu1 }
 0x3af   : > { %v1420_v3 = vpop.f32.mrb[20].mxu1 }
 0x3b0   : > { %v1427_v34 = vmul.f32 %v2938_v48, %v1420_v3  ;;  %v2616_v41 = vpop.f32.mrb[21].mxu1 }
 0x3b1   : > { %v1423_v43 = vpop.f32.mrb[22].mxu1 }
 0x3b2   : > { %1428 = vst [vmem:[#allocation2 + $0xc] sm:$0xf] %v1427_v34  ;;  %v2617_v46 = vpop.f32.mrb[23].mxu1 }
 0x3b9   : > { %v2229_v22 = vld [vmem:[#allocation2 + $0x8] sm:$0xff] }
 0x3ba   : > { %2233 = vst [vmem:[%s3627_s10 + $0x8] sm:$0xff] %v2229_v22 }
 0x3c2   : > { %v1616_v59 = vpop.f32.mrb[24].mxu1 }
 0x3c3   : > { %v1623_v28 = vmul.f32 %v2940_v24, %v1616_v59  ;;  %v2638_v31 = vpop.f32.mrb[25].mxu1 }
 0x3c4   : > { %v1619_v17 = vpop.f32.mrb[26].mxu1 }
 0x3c5   : > { %1624 = vst [vmem:[#allocation2 + $0x10] sm:$0xf] %v1623_v28  ;;  %v2639_v35 = vpop.f32.mrb[27].mxu1 }
 0x3d2   : > { %v1819_v27 = vpop.f32.mrb[28].mxu1 }
 0x3d3   : > { %v1826_v40 = vmul.f32 %v2942_v60, %v1819_v27  ;;  %v2660_v26 = vpop.f32.mrb[29].mxu1 }
 0x3d4   : > { %v1822_v29 = vpop.f32.mrb[30].mxu1 }
 0x3d5   : > { %1827 = vst [vmem:[#allocation2 + $0x14] sm:$0xf] %v1826_v40  ;;  %v2661_v37 = vpop.f32.mrb[31].mxu1 }
 0x3dc   : > { %v2230_v25 = vld [vmem:[#allocation2 + $0x10] sm:$0xff] }
 0x3dd   : > { %2234 = vst [vmem:[%s3627_s10 + $0x10] sm:$0xff] %v2230_v25 }
 0x3e3   : > { %v2019_v15 = vpop.f32.mrb[32].mxu1 }
 0x3e4   : > { %v2026_v6 = vmul.f32 %v2944_v7, %v2019_v15  ;;  %v2682_v4 = vpop.f32.mrb[33].mxu1 }
 0x3e5   : > { %v2022_v20 = vpop.f32.mrb[34].mxu1 }
 0x3e6   : > { %2027 = vst [vmem:[#allocation2 + $0x18] sm:$0xf] %v2026_v6  ;;  %v2683_v58 = vpop.f32.mrb[35].mxu1 }
 0x3f3   : > { %v2219_v9 = vpop.f32.mrb[36].mxu1 }
 0x3f4   : > { %v2226_v33 = vmul.f32 %v2946_v16, %v2219_v9  ;;  %v2704_v19 = vpop.f32.mrb[37].mxu1 }
 0x3f5   : > { %v2222_v49 = vpop.f32.mrb[38].mxu1 }
 0x3f6   : > { %2227 = vst [vmem:[#allocation2 + $0x1c] sm:$0xf] %v2226_v33  ;;  %v2705_v44 = vpop.f32.mrb[39].mxu1 }
 0x3fd   : > { %v2231_v51 = vld [vmem:[#allocation2 + $0x18] sm:$0xff] }
 0x3fe   : > { %2235 = vst [vmem:[%s3627_s10 + $0x18] sm:$0xff] %v2231_v51 }
 0x3ff   : > { %2960 = shalt.err (!%p2957_p10)
}
 0x400   : > { %s2961_s10 = scalar_lea.hbm %s3650_s9, 512  ;;  %s2965_s18 = scalar_lea.hbm %s3711_s6, 2048 }
 0x401   : > { %p2962_p11 = scmp.ne.s32.totalorder %s3650_s9, %s2961_s10  ;;  %p2966_p0 = scmp.lt.u32.totalorder %s3650_s9, %s3711_s6 }
 0x402   : > { %p2967_p1 = scmp.lt.u32.totalorder %s2965_s18, %s2961_s10  ;;  %p2969_p3 = scmp.lt.u32.totalorder %s2961_s10, %s3650_s9 }
 0x403   : > { %p2963_p12 = pnand %p2962_p11, %p3145_p8 }
 0x404   : > { %p2968_p2 = por %p2967_p1, %p2966_p0 }
 0x405   : > { %p2964_p13 = pneg %p2963_p12 }
 0x406   : > { %p2970_p4 = por %p2969_p3, %p2968_p2 }
 0x408   : > { %p2971_p5 = pnand %p2970_p4, %p2964_p13 }
 0x40a   : > { %2974 = shalt.err (!%p2971_p5)
}
 0x40b   : > { %s3047_s13 = smov 128   ;;  %s3048_s24 = smov 256  }
 0x40c   : > { %s3049_s14 = smov 8  }
 0x40d   : > { %2714 = dma.vmem_to_hbm [thread:$0]  (%p3145_p8), %s3645_s20, 512, %s3650_s9, %s2237_s25, %s3047_s13, %s3048_s24, %s3049_s14  }
 0x40e PF: > { %p2720_p6 = scmp.ge.s32.totalorder %s3041_s28, 2  ;;  %s2266_s0 = sand.u32 1, %s3013_s21  }
 0x40f   : > { %s2267_s10 = scalar_lea.sflag [#allocation5], %s2266_s0 }
 0x410   : > { %p2717_p7 = pnand %p2720_p6, %p3149_p9 }
 0x412   : > { %3008 = dma.done.wait (!%p2717_p7), %s2267_s10, 512  }
 0x413   : > { %3010 = vsyncadd (!%p2717_p7), %s2267_s10, 4294966784  ;;  %s19_s28 = sadd.s32 1, %s3041_s28   ;;  %s3717_s21 = smov %s3017_s22 }
 0x414   : > { %p16_p10 = scmp.ge.s32.totalorder %s19_s28, 6   ;;  %s3718_s22 = smov %s3021_s23 }
 0x415   : > { %s3719_s23 = smov %s3157_s16  ;;  %s3720_s24 = smov %s3033_s26 }
 0x416   : > { %s3721_s25 = smov %s3037_s27  ;;  %s3722_s26 = smov %s3725_s7 }
 0x417   : > { %s3723_s27 = smov %s3729_s8  ;;  %18 = sbr.rel (!%p16_p10) target bundleno = 7 (0x7), region = 128 }
 0x41e   :  { %2272 = vsyncpa [#allocation5], 1 }
 0x41f   :  { %2274 = vsyncpa [#allocation5 + $0x1], 1 }

</bundles_post_ra>
